<compile_context>
chip_gen: v6e
topology: v6e:2x2x1
jax: 0.10.0
libtpu: 0.0.40
codegen_flags: <defaults>
</compile_context>

<pallas_src>
import functools

import jax
import jax.numpy as jnp
from jax.experimental import pallas as pl
from jax.experimental.pallas import tpu as pltpu


def attention_kernel(e1_ref, e2_ref, w_ref, u_ref, out_ref, alpha_ref):
    w = w_ref[...]                     # [Din, Dout]
    u = u_ref[...]                     # [Dout, 1]

    # Per-modality attention scores.  Feed the dots straight from the refs so
    # the [tile_n, Din] tiles are not kept live in vregs across the softmax.
    v1 = jnp.tanh(jnp.dot(e1_ref[...], w, preferred_element_type=jnp.float32))
    v2 = jnp.tanh(jnp.dot(e2_ref[...], w, preferred_element_type=jnp.float32))
    s1 = jnp.dot(v1, u, preferred_element_type=jnp.float32) + 1e-6   # [tn, 1]
    s2 = jnp.dot(v2, u, preferred_element_type=jnp.float32) + 1e-6   # [tn, 1]

    # Numerically stable 2-way softmax with an EXACT divide (the approximate
    # EUP reciprocal introduced ~1e-3 relative error in alpha -> out mismatch).
    m = jnp.maximum(s1, s2)
    p1 = jnp.exp(s1 - m)
    p2 = jnp.exp(s2 - m)
    inv = 1.0 / (p1 + p2)
    a1 = p1 * inv                      # [tn, 1]
    a2 = p2 * inv                      # [tn, 1]

    # Weighted combination: re-read the embedding tiles from VMEM here.
    out_ref[...] = (a1 * e1_ref[...] + a2 * e2_ref[...]).astype(out_ref.dtype)

    # alpha written as one full-block store (pure VPU select, no lane concat).
    lane = jax.lax.broadcasted_iota(jnp.int32, (a1.shape[0], 2), 1)
    alpha_ref[...] = jnp.where(lane == 0, a1, a2).astype(alpha_ref.dtype)


def _choose_tile_n(n_pad, max_tile):
    """Largest 128-multiple tile dividing n_pad (already a 128 multiple),
    capped at max_tile.  On single-TC chips (v5e/v6e) the grid is a serial
    loop, so the single largest tile is best.  If the resulting step count is
    odd and > 1, accept up to a 2x smaller tile that yields an even step count
    so both v7x TensorCores get equal work (costs at most one extra ~0.35 us
    pipeline step on 1-TC chips -> noise for a mem-bound kernel)."""
    cands = [t for t in range(128, min(max_tile, n_pad) + 1, 128)
             if n_pad % t == 0]
    best = max(cands)
    steps = n_pad // best
    if steps > 1 and steps % 2 == 1:
        even = [t for t in cands if (n_pad // t) % 2 == 0 and 2 * t >= best]
        if even:
            best = max(even)
    return best


@functools.partial(jax.jit, static_argnames=("max_tile_n",))
def attention_layer(emb1, emb2, w_omega, u_omega, *, max_tile_n=2048):
    """emb1, emb2: [N, in_feat]; w_omega: [in_feat, out_feat]; u_omega: [out_feat, 1].

    Returns (out [N, in_feat], alpha [N, 2]) -- same as the PyTorch module.
    """
    n, d_in = emb1.shape
    d_out = w_omega.shape[1]

    # Pad the sample axis to a multiple of 128 (sublane/tile friendliness);
    # padded rows give alpha = 0.5/0.5 and out = 0 and are sliced off below.
    n_pad = ((n + 127) // 128) * 128
    if n_pad != n:
        pad = n_pad - n
        emb1_p = jnp.pad(emb1, ((0, pad), (0, 0)))
        emb2_p = jnp.pad(emb2, ((0, pad), (0, 0)))
    else:
        emb1_p, emb2_p = emb1, emb2

    tile_n = _choose_tile_n(n_pad, max_tile_n)

    w = w_omega.astype(jnp.float32)                     # [Din, Dout]
    u = u_omega.reshape(d_out, 1).astype(jnp.float32)   # [Dout, 1]

    grid = (n_pad // tile_n,)
    out, alpha = pl.pallas_call(
        attention_kernel,
        out_shape=(
            jax.ShapeDtypeStruct((n_pad, d_in), emb1.dtype),
            jax.ShapeDtypeStruct((n_pad, 2), jnp.float32),
        ),
        grid_spec=pltpu.PrefetchScalarGridSpec(
            num_scalar_prefetch=0,
            grid=grid,
            in_specs=[
                pl.BlockSpec((tile_n, d_in), lambda i: (i, 0)),
                pl.BlockSpec((tile_n, d_in), lambda i: (i, 0)),
                pl.BlockSpec((d_in, d_out), lambda i: (0, 0)),
                pl.BlockSpec((d_out, 1), lambda i: (0, 0)),
            ],
            out_specs=(
                pl.BlockSpec((tile_n, d_in), lambda i: (i, 0)),
                pl.BlockSpec((tile_n, 2), lambda i: (i, 0)),
            ),
        ),
        compiler_params=pltpu.CompilerParams(
            dimension_semantics=("parallel",),
            vmem_limit_bytes=64 * 1024 * 1024,
        ),
    )(emb1_p, emb2_p, w, u)

    if n_pad != n:
        out = out[:n]
        alpha = alpha[:n]
    return out, alpha


def reference(emb1, emb2, w_omega, u_omega):
    hi = jax.lax.Precision.HIGHEST
    emb = jnp.stack([emb1, emb2], axis=1)                              # [N, 2, Din]
    v = jnp.tanh(jnp.einsum("nmd,de->nme", emb, w_omega, precision=hi))
    vu = jnp.einsum("nme,eo->nmo", v, u_omega, precision=hi)[..., 0]   # [N, 2]
    alpha = jax.nn.softmax(vu + 1e-6, axis=-1)                         # [N, 2]
    out = jnp.einsum("nmd,nm->nd", emb, alpha, precision=hi)           # [N, Din]
    return out, alpha


if __name__ == "__main__":
    # Deterministic parameter init (Xavier uniform, matching reset_parameters).
    in_feat, out_feat = 32, 16
    N = 256

    key = jax.random.PRNGKey(0)
    k1, k2, k3, k4 = jax.random.split(key, 4)

    bw = (6.0 / (in_feat + out_feat)) ** 0.5
    bu = (6.0 / (out_feat + 1)) ** 0.5
    w_omega = jax.random.uniform(k1, (in_feat, out_feat), jnp.float32, -bw, bw)
    u_omega = jax.random.uniform(k2, (out_feat, 1), jnp.float32, -bu, bu)

    emb1 = jax.random.normal(k3, (N, in_feat), jnp.float32)
    emb2 = jax.random.normal(k4, (N, in_feat), jnp.float32)

    out, alpha = attention_layer(emb1, emb2, w_omega, u_omega)
    jax.block_until_ready((out, alpha))

    out_ref, alpha_ref = reference(emb1, emb2, w_omega, u_omega)
    assert out.shape == (N, in_feat) and alpha.shape == (N, 2)
    assert jnp.allclose(out, out_ref, atol=1e-3, rtol=1e-3), \
        float(jnp.max(jnp.abs(out - out_ref)))
    assert jnp.allclose(alpha, alpha_ref, atol=1e-3, rtol=1e-3), \
        float(jnp.max(jnp.abs(alpha - alpha_ref)))
    assert jnp.allclose(jnp.sum(alpha, axis=-1), 1.0, atol=1e-5)

    # Ragged batch: exercises the pad-to-128 path (N not a multiple of 128).
    M = 200
    out_b, alpha_b = attention_layer(emb1[:M], emb2[:M], w_omega, u_omega)
    jax.block_until_ready((out_b, alpha_b))
    assert out_b.shape == (M, in_feat) and alpha_b.shape == (M, 2)
    assert jnp.allclose(out_b, out_ref[:M], atol=1e-3, rtol=1e-3)
    assert jnp.allclose(alpha_b, alpha_ref[:M], atol=1e-3, rtol=1e-3)

    print("KERNEL_OK")
</pallas_src>

<mosaic_0001>
module attributes {stable_mosaic.version = 11 : i64} {
  func.func @attention_kernel(%arg0: i32, %arg1: memref<256x32xf32, #tpu.memory_space<vmem>>, %arg2: memref<256x32xf32, #tpu.memory_space<vmem>>, %arg3: memref<32x16xf32, #tpu.memory_space<vmem>>, %arg4: memref<16x1xf32, #tpu.memory_space<vmem>>, %arg5: memref<256x32xf32, #tpu.memory_space<vmem>>, %arg6: memref<256x2xf32, #tpu.memory_space<vmem>>) attributes {dimension_semantics = [#tpu.dimension_semantics<parallel>], iteration_bounds = array<i64: 1>, scalar_prefetch = 0 : i64, scratch_operands = 0 : i64, tpu.core_type = #tpu.core_type<tc>, window_params = [{transform_indices = @transform_0, window_bounds = array<i64: 256, 32>}, {transform_indices = @transform_1, window_bounds = array<i64: 256, 32>}, {pipeline_mode = #tpu.pipeline_mode<synchronous>, transform_indices = @transform_2, window_bounds = array<i64: 32, 16>}, {pipeline_mode = #tpu.pipeline_mode<synchronous>, transform_indices = @transform_3, window_bounds = array<i64: 16, 1>}, {transform_indices = @transform_4, window_bounds = array<i64: 256, 32>}, {transform_indices = @transform_5, window_bounds = array<i64: 256, 2>}]} {
    %c0 = arith.constant 0 : index
    %c0_0 = arith.constant 0 : index
    %0 = vector.load %arg3[%c0, %c0_0] : memref<32x16xf32, #tpu.memory_space<vmem>>, vector<32x16xf32>
    %c0_1 = arith.constant 0 : index
    %c0_2 = arith.constant 0 : index
    %1 = vector.load %arg4[%c0_1, %c0_2] : memref<16x1xf32, #tpu.memory_space<vmem>>, vector<16x1xf32>
    %c0_3 = arith.constant 0 : index
    %c0_4 = arith.constant 0 : index
    %2 = vector.load %arg1[%c0_3, %c0_4] : memref<256x32xf32, #tpu.memory_space<vmem>>, vector<256x32xf32>
    %cst = arith.constant dense<0.000000e+00> : vector<256x16xf32>
    %3 = tpu.matmul %2, %0, %cst {dimension_numbers = #tpu.dot_dimension_numbers<[1], [0], [0], [1], [0, 0, 1, 1], [], []>} : vector<256x32xf32>, vector<32x16xf32>, vector<256x16xf32> -> vector<256x16xf32>
    %4 = math.tanh %3 : vector<256x16xf32>
    %c0_5 = arith.constant 0 : index
    %c0_6 = arith.constant 0 : index
    %5 = vector.load %arg2[%c0_5, %c0_6] : memref<256x32xf32, #tpu.memory_space<vmem>>, vector<256x32xf32>
    %cst_7 = arith.constant dense<0.000000e+00> : vector<256x16xf32>
    %6 = tpu.matmul %5, %0, %cst_7 {dimension_numbers = #tpu.dot_dimension_numbers<[1], [0], [0], [1], [0, 0, 1, 1], [], []>} : vector<256x32xf32>, vector<32x16xf32>, vector<256x16xf32> -> vector<256x16xf32>
    %7 = math.tanh %6 : vector<256x16xf32>
    %cst_8 = arith.constant dense<0.000000e+00> : vector<256x1xf32>
    %8 = tpu.matmul %4, %1, %cst_8 {dimension_numbers = #tpu.dot_dimension_numbers<[1], [0], [0], [1], [0, 0, 1, 1], [], []>} : vector<256x16xf32>, vector<16x1xf32>, vector<256x1xf32> -> vector<256x1xf32>
    %cst_9 = arith.constant 9.99999997E-7 : f32
    %9 = vector.broadcast %cst_9 : f32 to vector<256x1xf32>
    %10 = arith.addf %8, %9 : vector<256x1xf32>
    %cst_10 = arith.constant dense<0.000000e+00> : vector<256x1xf32>
    %11 = tpu.matmul %7, %1, %cst_10 {dimension_numbers = #tpu.dot_dimension_numbers<[1], [0], [0], [1], [0, 0, 1, 1], [], []>} : vector<256x16xf32>, vector<16x1xf32>, vector<256x1xf32> -> vector<256x1xf32>
    %cst_11 = arith.constant 9.99999997E-7 : f32
    %12 = vector.broadcast %cst_11 : f32 to vector<256x1xf32>
    %13 = arith.addf %11, %12 : vector<256x1xf32>
    %14 = arith.maximumf %10, %13 : vector<256x1xf32>
    %15 = arith.subf %10, %14 : vector<256x1xf32>
    %16 = math.exp %15 : vector<256x1xf32>
    %17 = arith.subf %13, %14 : vector<256x1xf32>
    %18 = math.exp %17 : vector<256x1xf32>
    %19 = arith.addf %16, %18 : vector<256x1xf32>
    %cst_12 = arith.constant 1.000000e+00 : f32
    %20 = vector.broadcast %cst_12 : f32 to vector<256x1xf32>
    %21 = arith.divf %20, %19 : vector<256x1xf32>
    %22 = arith.mulf %16, %21 : vector<256x1xf32>
    %23 = arith.mulf %18, %21 : vector<256x1xf32>
    %c0_13 = arith.constant 0 : index
    %c0_14 = arith.constant 0 : index
    %24 = vector.load %arg1[%c0_13, %c0_14] : memref<256x32xf32, #tpu.memory_space<vmem>>, vector<256x32xf32>
    %25 = vector.broadcast %22 : vector<256x1xf32> to vector<256x32xf32>
    %26 = arith.mulf %25, %24 : vector<256x32xf32>
    %c0_15 = arith.constant 0 : index
    %c0_16 = arith.constant 0 : index
    %27 = vector.load %arg2[%c0_15, %c0_16] : memref<256x32xf32, #tpu.memory_space<vmem>>, vector<256x32xf32>
    %28 = vector.broadcast %23 : vector<256x1xf32> to vector<256x32xf32>
    %29 = arith.mulf %28, %27 : vector<256x32xf32>
    %30 = arith.addf %26, %29 : vector<256x32xf32>
    %c0_17 = arith.constant 0 : index
    %c0_18 = arith.constant 0 : index
    %31 = vector.load %arg5[%c0_17, %c0_18] : memref<256x32xf32, #tpu.memory_space<vmem>>, vector<256x32xf32>
    tpu.vector_store %arg5[%c0_17, %c0_18], %30 {strides = array<i32>} : memref<256x32xf32, #tpu.memory_space<vmem>>, vector<256x32xf32>,
    %32 = tpu.iota {dimensions = array<i32: 1>} : vector<256x2xi32>
    %c0_i32 = arith.constant 0 : i32
    %33 = vector.broadcast %c0_i32 : i32 to vector<256x2xi32>
    %34 = arith.cmpi eq, %32, %33 : vector<256x2xi32>
    %35 = vector.shape_cast %22 : vector<256x1xf32> to vector<256x1xf32>
    %36 = vector.broadcast %35 : vector<256x1xf32> to vector<256x2xf32>
    %37 = vector.shape_cast %23 : vector<256x1xf32> to vector<256x1xf32>
    %38 = vector.broadcast %37 : vector<256x1xf32> to vector<256x2xf32>
    %39 = arith.select %34, %36, %38 : vector<256x2xi1>, vector<256x2xf32>
    %c0_19 = arith.constant 0 : index
    %c0_20 = arith.constant 0 : index
    %40 = vector.load %arg6[%c0_19, %c0_20] : memref<256x2xf32, #tpu.memory_space<vmem>>, vector<256x2xf32>
    tpu.vector_store %arg6[%c0_19, %c0_20], %39 {strides = array<i32>} : memref<256x2xf32, #tpu.memory_space<vmem>>, vector<256x2xf32>,
    return
  }
  func.func @transform_0(%arg0: i32) -> (i32, i32) {
    %c0_i32 = arith.constant 0 : i32
    %c0_i32_0 = arith.constant 0 : i32
    return %arg0, %c0_i32 : i32, i32
  }
  func.func @transform_1(%arg0: i32) -> (i32, i32) {
    %c0_i32 = arith.constant 0 : i32
    %c0_i32_0 = arith.constant 0 : i32
    return %arg0, %c0_i32 : i32, i32
  }
  func.func @transform_2(%arg0: i32) -> (i32, i32) {
    %c0_i32 = arith.constant 0 : i32
    %c0_i32_0 = arith.constant 0 : i32
    %c0_i32_1 = arith.constant 0 : i32
    return %c0_i32, %c0_i32_0 : i32, i32
  }
  func.func @transform_3(%arg0: i32) -> (i32, i32) {
    %c0_i32 = arith.constant 0 : i32
    %c0_i32_0 = arith.constant 0 : i32
    %c0_i32_1 = arith.constant 0 : i32
    return %c0_i32, %c0_i32_0 : i32, i32
  }
  func.func @transform_4(%arg0: i32) -> (i32, i32) {
    %c0_i32 = arith.constant 0 : i32
    %c0_i32_0 = arith.constant 0 : i32
    return %arg0, %c0_i32 : i32, i32
  }
  func.func @transform_5(%arg0: i32) -> (i32, i32) {
    %c0_i32 = arith.constant 0 : i32
    %c0_i32_0 = arith.constant 0 : i32
    return %arg0, %c0_i32 : i32, i32
  }
}

</mosaic_0001>

<bundles_post_ra>
// kernel: attention_layer.1
= control target key start
LH: loop header
LB: loop body
LE: loop exit
PB: predicated region body
PF: predicated region fallthrough
CT: control target
= control target key end

     0   :  { %vm57_vm0 = vcmask 261120   ;;  %vm796_vm1 = vcmask 130048   ;;  %vm2306_vm3 = vcmask 15360   ;;  %s4382_s2 = inlined_call_operand.vmem [shape: f32[32,16], index: 2, kind: input, shape index: {}]   ;;  %s4383_s0 = inlined_call_operand.vmem [shape: f32[256,32], index: 0, kind: input, shape index: {}]   ;;  %s4384_s1 = inlined_call_operand.vmem [shape: f32[256,32], index: 1, kind: input, shape index: {}]   ;;  %s4385_s3 = inlined_call_operand.vmem [shape: f32[16,1], index: 3, kind: input, shape index: {}]   ;;  %s4386_s5 = inlined_call_operand.vmem [shape: f32[256,2], index: 5, kind: output, shape index: {1}]   ;;  %s4387_s4 = inlined_call_operand.vmem [shape: f32[256,32], index: 4, kind: output, shape index: {0}]  }
   0x1   :  { %v22_v0 = vld [vmem:[%s4382_s2 + $0x18] sm:$0xff]  ;;  %v21_v1 = vld [vmem:[%s4382_s2 + $0x10] sm:$0xff]  ;;  %v20_v2 = vld [vmem:[%s4382_s2 + $0x8] sm:$0xff] }
   0x2   :  { %2615 = vmatprep.subr.mxu0 %v22_v0  ;;  %2671 = vmatprep.subr.mxu1 %v22_v0  ;;  %v19_v3 = vld [vmem:[%s4382_s2] sm:$0xff]  ;;  %v26_v6 = vld [vmem:[%s4383_s0 + $0x8] sm:$0xff]  ;;  %v27_v8 = vld [vmem:[%s4383_s0 + $0x10] sm:$0xff] }
   0x3   :  { %2616 = vmatpush3.msra.mxu0 %v22_v0  ;;  %2672 = vmatpush3.msra.mxu1 %v22_v0  ;;  %v25_v4 = vld [vmem:[%s4383_s0] sm:$0xff]  ;;  %v412_v7 = vld [vmem:[%s4384_s1 + $0x8] sm:$0xff]  ;;  %v413_v9 = vld [vmem:[%s4384_s1 + $0x10] sm:$0xff] }
   0x4   :  { %2617 = vmatprep.subr.mxu0 %v21_v1  ;;  %2673 = vmatprep.subr.mxu1 %v21_v1  ;;  %v411_v5 = vld [vmem:[%s4384_s1] sm:$0xff]  ;;  %v28_v10 = vld [vmem:[%s4383_s0 + $0x18] sm:$0xff]  ;;  %v30_v14 = vld [vmem:[%s4383_s0 + $0x28] sm:$0xff] }
   0x5   :  { %2618 = vmatpush3.msra.mxu0 %v21_v1  ;;  %2674 = vmatpush3.msra.mxu1 %v21_v1  ;;  %v414_v11 = vld [vmem:[%s4384_s1 + $0x18] sm:$0xff]  ;;  %v29_v12 = vld [vmem:[%s4383_s0 + $0x20] sm:$0xff]  ;;  %v416_v15 = vld [vmem:[%s4384_s1 + $0x28] sm:$0xff] }
   0x6   :  { %2619 = vmatprep.subr.mxu0 %v20_v2  ;;  %2675 = vmatprep.subr.mxu1 %v20_v2  ;;  %v415_v13 = vld [vmem:[%s4384_s1 + $0x20] sm:$0xff]  ;;  %v31_v16 = vld [vmem:[%s4383_s0 + $0x30] sm:$0xff]  ;;  %v32_v18 = vld [vmem:[%s4383_s0 + $0x38] sm:$0xff] }
   0x7   :  { %2620 = vmatpush3.msra.mxu0 %v20_v2  ;;  %2676 = vmatpush3.msra.mxu1 %v20_v2  ;;  %v417_v17 = vld [vmem:[%s4384_s1 + $0x30] sm:$0xff]  ;;  %v418_v19 = vld [vmem:[%s4384_s1 + $0x38] sm:$0xff]  ;;  %v33_v20 = vld [vmem:[%s4383_s0 + $0x40] sm:$0xff] }
   0x8   :  { %2621 = vmatprep.subr.mxu0 %v19_v3  ;;  %2677 = vmatprep.subr.mxu1 %v19_v3  ;;  %v419_v21 = vld [vmem:[%s4384_s1 + $0x40] sm:$0xff]  ;;  %v24_v22 = vld [vmem:[%s4385_s3 + $0x8] sm:$0xff]  ;;  %v35_v25 = vld [vmem:[%s4383_s0 + $0x50] sm:$0xff] }
   0x9   :  { %2622 = vmatpush3.msra.mxu0 %v19_v3  ;;  %2623 = vmatprep.mubr.msk.f32.mxu0 %vm57_vm0, %v25_v4  ;;  %v34_v23 = vld [vmem:[%s4383_s0 + $0x48] sm:$0xff]  ;;  %v421_v26 = vld [vmem:[%s4384_s1 + $0x50] sm:$0xff]  ;;  %v23_v27 = vld [vmem:[%s4385_s3] sm:$0xff] }
   0xa   :  { %2678 = vmatpush3.msra.mxu1 %v19_v3  ;;  %2679 = vmatprep.mubr.msk.f32.mxu1 %vm57_vm0, %v411_v5  ;;  %v420_v24 = vld [vmem:[%s4384_s1 + $0x48] sm:$0xff]  ;;  %v36_v28 = vld [vmem:[%s4383_s0 + $0x58] sm:$0xff]  ;;  %v37_v30 = vld [vmem:[%s4383_s0 + $0x60] sm:$0xff] }
   0xb   :  { %2624 = vmatmul.mubr.msk.f32.vlgmr.msra.gmra.mxu0 %vm57_vm0, %v26_v6  ;;  %2680 = vmatmul.mubr.msk.f32.vlgmr.msra.gmra.mxu1 %vm57_vm0, %v412_v7  ;;  %v422_v29 = vld [vmem:[%s4384_s1 + $0x58] sm:$0xff]  ;;  %v423_v31 = vld [vmem:[%s4384_s1 + $0x60] sm:$0xff]  ;;  %v38_v32 = vld [vmem:[%s4383_s0 + $0x68] sm:$0xff] }
   0xc   :  { %2626 = vmatprep.mubr.msk.f32.mxu0 %vm57_vm0, %v27_v8  ;;  %2682 = vmatprep.mubr.msk.f32.mxu1 %vm57_vm0, %v413_v9  ;;  %v424_v33 = vld [vmem:[%s4384_s1 + $0x68] sm:$0xff]  ;;  %v39_v34 = vld [vmem:[%s4383_s0 + $0x70] sm:$0xff]  ;;  %v40_v36 = vld [vmem:[%s4383_s0 + $0x78] sm:$0xff] }
   0xd   :  { %2727 = vmatprep.subr.mxu0 %v24_v22  ;;  %2779 = vmatprep.subr.mxu1 %v24_v22  ;;  %v425_v35 = vld [vmem:[%s4384_s1 + $0x70] sm:$0xff]  ;;  %v426_v37 = vld [vmem:[%s4384_s1 + $0x78] sm:$0xff]  ;;  %v41_v38 = vld [vmem:[%s4383_s0 + $0x80] sm:$0xff] }
   0xe   :  { %2728 = vmatpush3.msra.mxu0 %v24_v22  ;;  %2780 = vmatpush3.msra.mxu1 %v24_v22  ;;  %v427_v39 = vld [vmem:[%s4384_s1 + $0x80] sm:$0xff]  ;;  %v42_v40 = vld [vmem:[%s4383_s0 + $0x88] sm:$0xff]  ;;  %v43_v42 = vld [vmem:[%s4383_s0 + $0x90] sm:$0xff] }
   0xf   :  { %2627 = vmatmul.mubr.msk.f32.gmra.mxu0 %vm57_vm0, %v28_v10  ;;  %2683 = vmatmul.mubr.msk.f32.gmra.mxu1 %vm57_vm0, %v414_v11  ;;  %v428_v41 = vld [vmem:[%s4384_s1 + $0x88] sm:$0xff]  ;;  %v429_v43 = vld [vmem:[%s4384_s1 + $0x90] sm:$0xff]  ;;  %v44_v44 = vld [vmem:[%s4383_s0 + $0x98] sm:$0xff] }
  0x10   :  { %2629 = vmatprep.mubr.msk.f32.mxu0 %vm57_vm0, %v29_v12  ;;  %2685 = vmatprep.mubr.msk.f32.mxu1 %vm57_vm0, %v415_v13  ;;  %v430_v45 = vld [vmem:[%s4384_s1 + $0x98] sm:$0xff]  ;;  %v45_v46 = vld [vmem:[%s4383_s0 + $0xa0] sm:$0xff]  ;;  %v46_v48 = vld [vmem:[%s4383_s0 + $0xa8] sm:$0xff] }
  0x11   :  { %2729 = vmatprep.subr.mxu0 %v23_v27  ;;  %2781 = vmatprep.subr.mxu1 %v23_v27  ;;  %v431_v47 = vld [vmem:[%s4384_s1 + $0xa0] sm:$0xff]  ;;  %v432_v49 = vld [vmem:[%s4384_s1 + $0xa8] sm:$0xff]  ;;  %v47_v50 = vld [vmem:[%s4383_s0 + $0xb0] sm:$0xff] }
  0x12   :  { %2730 = vmatpush3.msra.mxu0 %v23_v27  ;;  %2782 = vmatpush3.msra.mxu1 %v23_v27  ;;  %v433_v51 = vld [vmem:[%s4384_s1 + $0xb0] sm:$0xff]  ;;  %v48_v52 = vld [vmem:[%s4383_s0 + $0xb8] sm:$0xff]  ;;  %v49_v54 = vld [vmem:[%s4383_s0 + $0xc0] sm:$0xff] }
  0x13   :  { %2630 = vmatmul.mubr.msk.f32.gmra.mxu0 %vm57_vm0, %v30_v14  ;;  %2686 = vmatmul.mubr.msk.f32.gmra.mxu1 %vm57_vm0, %v416_v15  ;;  %v434_v53 = vld [vmem:[%s4384_s1 + $0xb8] sm:$0xff]  ;;  %v435_v55 = vld [vmem:[%s4384_s1 + $0xc0] sm:$0xff]  ;;  %v50_v56 = vld [vmem:[%s4383_s0 + $0xc8] sm:$0xff] }
  0x14   :  { %2632 = vmatprep.mubr.msk.f32.mxu0 %vm57_vm0, %v31_v16  ;;  %2688 = vmatprep.mubr.msk.f32.mxu1 %vm57_vm0, %v417_v17  ;;  %v436_v57 = vld [vmem:[%s4384_s1 + $0xc8] sm:$0xff]  ;;  %v51_v58 = vld [vmem:[%s4383_s0 + $0xd0] sm:$0xff]  ;;  %v52_v60 = vld [vmem:[%s4383_s0 + $0xd8] sm:$0xff] }
  0x15   :  { %v437_v59 = vld [vmem:[%s4384_s1 + $0xd0] sm:$0xff]  ;;  %v438_v61 = vld [vmem:[%s4384_s1 + $0xd8] sm:$0xff]  ;;  %v53_v62 = vld [vmem:[%s4383_s0 + $0xe0] sm:$0xff] }
  0x16   :  { %v439_v63 = vld [vmem:[%s4384_s1 + $0xe0] sm:$0xff]  ;;  %v54_v0 = vld [vmem:[%s4383_s0 + $0xe8] sm:$0xff]  ;;  %v55_v2 = vld [vmem:[%s4383_s0 + $0xf0] sm:$0xff] }
  0x17   :  { %2633 = vmatmul.mubr.msk.f32.gmra.mxu0 %vm57_vm0, %v32_v18  ;;  %2689 = vmatmul.mubr.msk.f32.gmra.mxu1 %vm57_vm0, %v418_v19  ;;  %v440_v1 = vld [vmem:[%s4384_s1 + $0xe8] sm:$0xff]  ;;  %v441_v3 = vld [vmem:[%s4384_s1 + $0xf0] sm:$0xff]  ;;  %v56_v4 = vld [vmem:[%s4383_s0 + $0xf8] sm:$0xff] }
  0x18   :  { %2635 = vmatprep.mubr.msk.f32.mxu0 %vm57_vm0, %v33_v20  ;;  %2691 = vmatprep.mubr.msk.f32.mxu1 %vm57_vm0, %v419_v21  ;;  %v442_v5 = vld [vmem:[%s4384_s1 + $0xf8] sm:$0xff] }
  0x1b   :  { %2636 = vmatmul.mubr.msk.f32.gmra.mxu0 %vm57_vm0, %v34_v23  ;;  %2692 = vmatmul.mubr.msk.f32.gmra.mxu1 %vm57_vm0, %v420_v24 }
  0x1c   :  { %2638 = vmatprep.mubr.msk.f32.mxu0 %vm57_vm0, %v35_v25  ;;  %2694 = vmatprep.mubr.msk.f32.mxu1 %vm57_vm0, %v421_v26 }
  0x1f   :  { %2639 = vmatmul.mubr.msk.f32.gmra.mxu0 %vm57_vm0, %v36_v28  ;;  %2695 = vmatmul.mubr.msk.f32.gmra.mxu1 %vm57_vm0, %v422_v29 }
  0x20   :  { %2641 = vmatprep.mubr.msk.f32.mxu0 %vm57_vm0, %v37_v30  ;;  %2697 = vmatprep.mubr.msk.f32.mxu1 %vm57_vm0, %v423_v31 }
  0x23   :  { %2642 = vmatmul.mubr.msk.f32.gmra.mxu0 %vm57_vm0, %v38_v32  ;;  %2698 = vmatmul.mubr.msk.f32.gmra.mxu1 %vm57_vm0, %v424_v33 }
  0x24   :  { %2644 = vmatprep.mubr.msk.f32.mxu0 %vm57_vm0, %v39_v34  ;;  %2700 = vmatprep.mubr.msk.f32.mxu1 %vm57_vm0, %v425_v35 }
  0x27   :  { %2645 = vmatmul.mubr.msk.f32.gmra.mxu0 %vm57_vm0, %v40_v36  ;;  %2701 = vmatmul.mubr.msk.f32.gmra.mxu1 %vm57_vm0, %v426_v37 }
  0x28   :  { %2647 = vmatprep.mubr.msk.f32.mxu0 %vm57_vm0, %v41_v38  ;;  %2703 = vmatprep.mubr.msk.f32.mxu1 %vm57_vm0, %v427_v39 }
  0x2b   :  { %2648 = vmatmul.mubr.msk.f32.gmra.mxu0 %vm57_vm0, %v42_v40  ;;  %2704 = vmatmul.mubr.msk.f32.gmra.mxu1 %vm57_vm0, %v428_v41 }
  0x2c   :  { %2650 = vmatprep.mubr.msk.f32.mxu0 %vm57_vm0, %v43_v42  ;;  %2706 = vmatprep.mubr.msk.f32.mxu1 %vm57_vm0, %v429_v43 }
  0x2f   :  { %2651 = vmatmul.mubr.msk.f32.gmra.mxu0 %vm57_vm0, %v44_v44  ;;  %2707 = vmatmul.mubr.msk.f32.gmra.mxu1 %vm57_vm0, %v430_v45 }
  0x30   :  { %2653 = vmatprep.mubr.msk.f32.mxu0 %vm57_vm0, %v45_v46  ;;  %2709 = vmatprep.mubr.msk.f32.mxu1 %vm57_vm0, %v431_v47 }
  0x33   :  { %2654 = vmatmul.mubr.msk.f32.gmra.mxu0 %vm57_vm0, %v46_v48  ;;  %2710 = vmatmul.mubr.msk.f32.gmra.mxu1 %vm57_vm0, %v432_v49 }
  0x34   :  { %2656 = vmatprep.mubr.msk.f32.mxu0 %vm57_vm0, %v47_v50  ;;  %2712 = vmatprep.mubr.msk.f32.mxu1 %vm57_vm0, %v433_v51 }
  0x37   :  { %2657 = vmatmul.mubr.msk.f32.gmra.mxu0 %vm57_vm0, %v48_v52  ;;  %2713 = vmatmul.mubr.msk.f32.gmra.mxu1 %vm57_vm0, %v434_v53 }
  0x38   :  { %2659 = vmatprep.mubr.msk.f32.mxu0 %vm57_vm0, %v49_v54  ;;  %2715 = vmatprep.mubr.msk.f32.mxu1 %vm57_vm0, %v435_v55 }
  0x3b   :  { %2660 = vmatmul.mubr.msk.f32.gmra.mxu0 %vm57_vm0, %v50_v56  ;;  %2716 = vmatmul.mubr.msk.f32.gmra.mxu1 %vm57_vm0, %v436_v57 }
  0x3c   :  { %2662 = vmatprep.mubr.msk.f32.mxu0 %vm57_vm0, %v51_v58  ;;  %2718 = vmatprep.mubr.msk.f32.mxu1 %vm57_vm0, %v437_v59 }
  0x3f   :  { %2663 = vmatmul.mubr.msk.f32.gmra.mxu0 %vm57_vm0, %v52_v60  ;;  %2719 = vmatmul.mubr.msk.f32.gmra.mxu1 %vm57_vm0, %v438_v61 }
  0x40   :  { %2665 = vmatprep.mubr.msk.f32.mxu0 %vm57_vm0, %v53_v62  ;;  %2721 = vmatprep.mubr.msk.f32.mxu1 %vm57_vm0, %v439_v63 }
  0x43   :  { %2666 = vmatmul.mubr.msk.f32.gmra.mxu0 %vm57_vm0, %v54_v0  ;;  %2722 = vmatmul.mubr.msk.f32.gmra.mxu1 %vm57_vm0, %v440_v1 }
  0x44   :  { %2668 = vmatprep.mubr.msk.f32.mxu0 %vm57_vm0, %v55_v2  ;;  %2724 = vmatprep.mubr.msk.f32.mxu1 %vm57_vm0, %v441_v3 }
  0x47   :  { %2669 = vmatmul.mubr.msk.f32.gmra.mxu0 %vm57_vm0, %v56_v4  ;;  %2725 = vmatmul.mubr.msk.f32.gmra.mxu1 %vm57_vm0, %v442_v5 }
  0xcb   :  { %v2625_v6 = vpop.f32.mrf.mxu0  ;;  %v2681_v7 = vpop.f32.mrf.mxu1 }
  0xcc   :  { %2834 = vtanh.f32 %v2625_v6 }
  0xcd   :  { %2836 = vtanh.f32 %v2681_v7  ;;  %v220_v8 = vpop.f32.mrf.mxu0  ;;  %v605_v9 = vpop.f32.mrf.mxu1 }
  0xce   :  { %2838 = vtanh.f32 %v220_v8 }
  0xcf   :  { %2840 = vtanh.f32 %v605_v9  ;;  %v2628_v10 = vpop.f32.mrf.mxu0  ;;  %v2684_v11 = vpop.f32.mrf.mxu1 }
  0xd0   :  { %2842 = vtanh.f32 %v2628_v10 }
  0xd1   :  { %2844 = vtanh.f32 %v2684_v11  ;;  %v230_v12 = vpop.f32.mrf.mxu0  ;;  %v615_v13 = vpop.f32.mrf.mxu1 }
  0xd2   :  { %2846 = vtanh.f32 %v230_v12 }
  0xd3   :  { %2848 = vtanh.f32 %v615_v13  ;;  %v2631_v14 = vpop.f32.mrf.mxu0  ;;  %v2687_v15 = vpop.f32.mrf.mxu1 }
  0xd4   :  { %2850 = vtanh.f32 %v2631_v14 }
  0xd5   :  { %2852 = vtanh.f32 %v2687_v15  ;;  %v240_v16 = vpop.f32.mrf.mxu0  ;;  %v625_v17 = vpop.f32.mrf.mxu1 }
  0xd6   :  { %2854 = vtanh.f32 %v240_v16 }
  0xd7   :  { %2856 = vtanh.f32 %v625_v17  ;;  %v2634_v18 = vpop.f32.mrf.mxu0  ;;  %v2690_v19 = vpop.f32.mrf.mxu1 }
  0xd8   :  { %2858 = vtanh.f32 %v2634_v18 }
  0xd9   :  { %v2835_v20 = vpop.eup %2834  ;;  %2860 = vtanh.f32 %v2690_v19  ;;  %v250_v21 = vpop.f32.mrf.mxu0 }
  0xda   :  { %v635_v22 = vpop.f32.mrf.mxu1  ;;  %v2837_v23 = vpop.eup %2836  ;;  %2862 = vtanh.f32 %v250_v21 }
  0xdb   :  { %v2839_v24 = vpop.eup %2838  ;;  %2864 = vtanh.f32 %v635_v22  ;;  %v2637_v25 = vpop.f32.mrf.mxu0 }
  0xdc   :  { %v2693_v26 = vpop.f32.mrf.mxu1  ;;  %v2841_v27 = vpop.eup %2840  ;;  %2866 = vtanh.f32 %v2637_v25  ;;  %2731 = vmatprep.mubr.msk.f32.mxu0 %vm796_vm1, %v2839_v24 }
  0xdd   :  { %v2843_v28 = vpop.eup %2842  ;;  %2868 = vtanh.f32 %v2693_v26  ;;  %2783 = vmatprep.mubr.msk.f32.mxu1 %vm796_vm1, %v2841_v27  ;;  %v260_v29 = vpop.f32.mrf.mxu0  ;;  %2732 = vmatmul.mubr.msk.f32.vlgmr.msra.gmra.mxu0 %vm796_vm1, %v2835_v20 }
  0xde   :  { %v645_v30 = vpop.f32.mrf.mxu1  ;;  %v2845_v31 = vpop.eup %2844  ;;  %2870 = vtanh.f32 %v260_v29  ;;  %2784 = vmatmul.mubr.msk.f32.vlgmr.msra.gmra.mxu1 %vm796_vm1, %v2837_v23 }
  0xdf   :  { %v2847_v32 = vpop.eup %2846  ;;  %2872 = vtanh.f32 %v645_v30  ;;  %v2640_v33 = vpop.f32.mrf.mxu0 }
  0xe0   :  { %v2696_v34 = vpop.f32.mrf.mxu1  ;;  %v2849_v35 = vpop.eup %2848  ;;  %2874 = vtanh.f32 %v2640_v33  ;;  %2734 = vmatprep.mubr.msk.f32.mxu0 %vm796_vm1, %v2847_v32 }
  0xe1   :  { %v2851_v36 = vpop.eup %2850  ;;  %2876 = vtanh.f32 %v2696_v34  ;;  %2786 = vmatprep.mubr.msk.f32.mxu1 %vm796_vm1, %v2849_v35  ;;  %v270_v37 = vpop.f32.mrf.mxu0  ;;  %2735 = vmatmul.mubr.msk.f32.gmra.mxu0 %vm796_vm1, %v2843_v28 }
  0xe2   :  { %v655_v38 = vpop.f32.mrf.mxu1  ;;  %v2853_v39 = vpop.eup %2852  ;;  %2878 = vtanh.f32 %v270_v37  ;;  %2787 = vmatmul.mubr.msk.f32.gmra.mxu1 %vm796_vm1, %v2845_v31 }
  0xe3   :  { %v2855_v40 = vpop.eup %2854  ;;  %2880 = vtanh.f32 %v655_v38  ;;  %v2643_v41 = vpop.f32.mrf.mxu0 }
  0xe4   :  { %v2699_v42 = vpop.f32.mrf.mxu1  ;;  %v2857_v43 = vpop.eup %2856  ;;  %2882 = vtanh.f32 %v2643_v41  ;;  %2737 = vmatprep.mubr.msk.f32.mxu0 %vm796_vm1, %v2855_v40 }
  0xe5   :  { %v2859_v44 = vpop.eup %2858  ;;  %2884 = vtanh.f32 %v2699_v42  ;;  %2789 = vmatprep.mubr.msk.f32.mxu1 %vm796_vm1, %v2857_v43  ;;  %v280_v45 = vpop.f32.mrf.mxu0  ;;  %2738 = vmatmul.mubr.msk.f32.gmra.mxu0 %vm796_vm1, %v2851_v36 }
  0xe6   :  { %v665_v46 = vpop.f32.mrf.mxu1  ;;  %v2861_v47 = vpop.eup %2860  ;;  %2886 = vtanh.f32 %v280_v45  ;;  %2790 = vmatmul.mubr.msk.f32.gmra.mxu1 %vm796_vm1, %v2853_v39 }
  0xe7   :  { %v2863_v48 = vpop.eup %2862  ;;  %2888 = vtanh.f32 %v665_v46  ;;  %v2646_v49 = vpop.f32.mrf.mxu0 }
  0xe8   :  { %v2702_v50 = vpop.f32.mrf.mxu1  ;;  %v2865_v51 = vpop.eup %2864  ;;  %2740 = vmatprep.mubr.msk.f32.mxu0 %vm796_vm1, %v2863_v48  ;;  %2890 = vtanh.f32 %v2646_v49 }
  0xe9   :  { %v2867_v52 = vpop.eup %2866  ;;  %2792 = vmatprep.mubr.msk.f32.mxu1 %vm796_vm1, %v2865_v51  ;;  %2741 = vmatmul.mubr.msk.f32.gmra.mxu0 %vm796_vm1, %v2859_v44  ;;  %2892 = vtanh.f32 %v2702_v50  ;;  %v290_v53 = vpop.f32.mrf.mxu0 }
  0xea   :  { %v675_v54 = vpop.f32.mrf.mxu1  ;;  %v2869_v55 = vpop.eup %2868  ;;  %2793 = vmatmul.mubr.msk.f32.gmra.mxu1 %vm796_vm1, %v2861_v47  ;;  %2894 = vtanh.f32 %v290_v53 }
  0xeb   :  { %v2871_v56 = vpop.eup %2870  ;;  %2896 = vtanh.f32 %v675_v54  ;;  %v2649_v57 = vpop.f32.mrf.mxu0 }
  0xec   :  { %v2705_v58 = vpop.f32.mrf.mxu1  ;;  %v2873_v59 = vpop.eup %2872  ;;  %2743 = vmatprep.mubr.msk.f32.mxu0 %vm796_vm1, %v2871_v56  ;;  %2898 = vtanh.f32 %v2649_v57 }
  0xed   :  { %v2875_v60 = vpop.eup %2874  ;;  %2795 = vmatprep.mubr.msk.f32.mxu1 %vm796_vm1, %v2873_v59  ;;  %2744 = vmatmul.mubr.msk.f32.gmra.mxu0 %vm796_vm1, %v2867_v52  ;;  %2900 = vtanh.f32 %v2705_v58  ;;  %v300_v61 = vpop.f32.mrf.mxu0 }
  0xee   :  { %v685_v62 = vpop.f32.mrf.mxu1  ;;  %v2877_v63 = vpop.eup %2876  ;;  %2796 = vmatmul.mubr.msk.f32.gmra.mxu1 %vm796_vm1, %v2869_v55  ;;  %2902 = vtanh.f32 %v300_v61 }
  0xef   :  { %v2879_v0 = vpop.eup %2878  ;;  %2904 = vtanh.f32 %v685_v62  ;;  %v2652_v1 = vpop.f32.mrf.mxu0 }
  0xf0   :  { %v2708_v2 = vpop.f32.mrf.mxu1  ;;  %v2881_v3 = vpop.eup %2880  ;;  %2746 = vmatprep.mubr.msk.f32.mxu0 %vm796_vm1, %v2879_v0  ;;  %2906 = vtanh.f32 %v2652_v1 }
  0xf1   :  { %v2883_v4 = vpop.eup %2882  ;;  %2798 = vmatprep.mubr.msk.f32.mxu1 %vm796_vm1, %v2881_v3  ;;  %2747 = vmatmul.mubr.msk.f32.gmra.mxu0 %vm796_vm1, %v2875_v60  ;;  %2908 = vtanh.f32 %v2708_v2  ;;  %v310_v5 = vpop.f32.mrf.mxu0 }
  0xf2   :  { %v695_v6 = vpop.f32.mrf.mxu1  ;;  %v2885_v7 = vpop.eup %2884  ;;  %2799 = vmatmul.mubr.msk.f32.gmra.mxu1 %vm796_vm1, %v2877_v63  ;;  %2910 = vtanh.f32 %v310_v5 }
  0xf3   :  { %v2887_v8 = vpop.eup %2886  ;;  %2912 = vtanh.f32 %v695_v6  ;;  %v2655_v9 = vpop.f32.mrf.mxu0  ;;  %v3218_v6 = vmov 0  }
  0xf4   :  { %v2711_v10 = vpop.f32.mrf.mxu1  ;;  %v2889_v11 = vpop.eup %2888  ;;  %2749 = vmatprep.mubr.msk.f32.mxu0 %vm796_vm1, %v2887_v8  ;;  %2914 = vtanh.f32 %v2655_v9  ;;  %2833 = vset.pattern.permute.xlu1 %v3218_v6 }
  0xf5   :  { %v2891_v12 = vpop.eup %2890  ;;  %2801 = vmatprep.mubr.msk.f32.mxu1 %vm796_vm1, %v2889_v11  ;;  %2750 = vmatmul.mubr.msk.f32.gmra.mxu0 %vm796_vm1, %v2883_v4  ;;  %2916 = vtanh.f32 %v2711_v10  ;;  %v320_v13 = vpop.f32.mrf.mxu0 }
  0xf6   :  { %v705_v14 = vpop.f32.mrf.mxu1  ;;  %v2893_v15 = vpop.eup %2892  ;;  %2802 = vmatmul.mubr.msk.f32.gmra.mxu1 %vm796_vm1, %v2885_v7  ;;  %2918 = vtanh.f32 %v320_v13  ;;  %2832 = vset.pattern.permute.xlu0 %v3218_v6 }
  0xf7   :  { %v2895_v16 = vpop.eup %2894  ;;  %2920 = vtanh.f32 %v705_v14  ;;  %v2658_v17 = vpop.f32.mrf.mxu0 }
  0xf8   :  { %v2714_v18 = vpop.f32.mrf.mxu1  ;;  %v2897_v19 = vpop.eup %2896  ;;  %2752 = vmatprep.mubr.msk.f32.mxu0 %vm796_vm1, %v2895_v16  ;;  %2922 = vtanh.f32 %v2658_v17 }
  0xf9   :  { %v2899_v20 = vpop.eup %2898  ;;  %2804 = vmatprep.mubr.msk.f32.mxu1 %vm796_vm1, %v2897_v19  ;;  %2753 = vmatmul.mubr.msk.f32.gmra.mxu0 %vm796_vm1, %v2891_v12  ;;  %2924 = vtanh.f32 %v2714_v18  ;;  %v330_v21 = vpop.f32.mrf.mxu0 }
  0xfa   :  { %v715_v22 = vpop.f32.mrf.mxu1  ;;  %v2901_v23 = vpop.eup %2900  ;;  %2805 = vmatmul.mubr.msk.f32.gmra.mxu1 %vm796_vm1, %v2893_v15  ;;  %2926 = vtanh.f32 %v330_v21 }
  0xfb   :  { %v2903_v24 = vpop.eup %2902  ;;  %2928 = vtanh.f32 %v715_v22  ;;  %v2661_v25 = vpop.f32.mrf.mxu0 }
  0xfc   :  { %v2717_v26 = vpop.f32.mrf.mxu1  ;;  %v2905_v27 = vpop.eup %2904  ;;  %2755 = vmatprep.mubr.msk.f32.mxu0 %vm796_vm1, %v2903_v24  ;;  %2930 = vtanh.f32 %v2661_v25 }
  0xfd   :  { %v2907_v28 = vpop.eup %2906  ;;  %2807 = vmatprep.mubr.msk.f32.mxu1 %vm796_vm1, %v2905_v27  ;;  %2756 = vmatmul.mubr.msk.f32.gmra.mxu0 %vm796_vm1, %v2899_v20  ;;  %2932 = vtanh.f32 %v2717_v26  ;;  %v340_v29 = vpop.f32.mrf.mxu0 }
  0xfe   :  { %v725_v30 = vpop.f32.mrf.mxu1  ;;  %v2909_v31 = vpop.eup %2908  ;;  %2808 = vmatmul.mubr.msk.f32.gmra.mxu1 %vm796_vm1, %v2901_v23  ;;  %2934 = vtanh.f32 %v340_v29 }
  0xff   :  { %v2911_v32 = vpop.eup %2910  ;;  %2936 = vtanh.f32 %v725_v30  ;;  %v2664_v33 = vpop.f32.mrf.mxu0 }
 0x100   :  { %v2720_v34 = vpop.f32.mrf.mxu1  ;;  %v2913_v35 = vpop.eup %2912  ;;  %2758 = vmatprep.mubr.msk.f32.mxu0 %vm796_vm1, %v2911_v32  ;;  %2938 = vtanh.f32 %v2664_v33 }
 0x101   :  { %v2915_v36 = vpop.eup %2914  ;;  %2810 = vmatprep.mubr.msk.f32.mxu1 %vm796_vm1, %v2913_v35  ;;  %2759 = vmatmul.mubr.msk.f32.gmra.mxu0 %vm796_vm1, %v2907_v28  ;;  %2940 = vtanh.f32 %v2720_v34  ;;  %v350_v37 = vpop.f32.mrf.mxu0 }
 0x102   :  { %v735_v38 = vpop.f32.mrf.mxu1  ;;  %v2917_v39 = vpop.eup %2916  ;;  %2811 = vmatmul.mubr.msk.f32.gmra.mxu1 %vm796_vm1, %v2909_v31  ;;  %2942 = vtanh.f32 %v350_v37 }
 0x103   :  { %v2919_v40 = vpop.eup %2918  ;;  %2944 = vtanh.f32 %v735_v38  ;;  %v2667_v41 = vpop.f32.mrf.mxu0 }
 0x104   :  { %v2723_v42 = vpop.f32.mrf.mxu1  ;;  %v2921_v43 = vpop.eup %2920  ;;  %2761 = vmatprep.mubr.msk.f32.mxu0 %vm796_vm1, %v2919_v40  ;;  %2946 = vtanh.f32 %v2667_v41 }
 0x105   :  { %v2923_v44 = vpop.eup %2922  ;;  %2813 = vmatprep.mubr.msk.f32.mxu1 %vm796_vm1, %v2921_v43  ;;  %2762 = vmatmul.mubr.msk.f32.gmra.mxu0 %vm796_vm1, %v2915_v36  ;;  %2948 = vtanh.f32 %v2723_v42  ;;  %v360_v45 = vpop.f32.mrf.mxu0 }
 0x106   :  { %v745_v46 = vpop.f32.mrf.mxu1  ;;  %v2925_v47 = vpop.eup %2924  ;;  %2814 = vmatmul.mubr.msk.f32.gmra.mxu1 %vm796_vm1, %v2917_v39  ;;  %2950 = vtanh.f32 %v360_v45 }
 0x107   :  { %v2927_v48 = vpop.eup %2926  ;;  %2952 = vtanh.f32 %v745_v46  ;;  %v2670_v49 = vpop.f32.mrf.mxu0 }
 0x108   :  { %v2726_v50 = vpop.f32.mrf.mxu1  ;;  %v2929_v51 = vpop.eup %2928  ;;  %2764 = vmatprep.mubr.msk.f32.mxu0 %vm796_vm1, %v2927_v48  ;;  %2954 = vtanh.f32 %v2670_v49 }
 0x109   :  { %v2931_v52 = vpop.eup %2930  ;;  %2816 = vmatprep.mubr.msk.f32.mxu1 %vm796_vm1, %v2929_v51  ;;  %2765 = vmatmul.mubr.msk.f32.gmra.mxu0 %vm796_vm1, %v2923_v44  ;;  %2956 = vtanh.f32 %v2726_v50  ;;  %v370_v53 = vpop.f32.mrf.mxu0 }
 0x10a   :  { %v755_v54 = vpop.f32.mrf.mxu1  ;;  %v2933_v55 = vpop.eup %2932  ;;  %2817 = vmatmul.mubr.msk.f32.gmra.mxu1 %vm796_vm1, %v2925_v47  ;;  %2958 = vtanh.f32 %v370_v53 }
 0x10b   :  { %v2935_v56 = vpop.eup %2934  ;;  %2960 = vtanh.f32 %v755_v54 }
 0x10c   :  { %v2937_v57 = vpop.eup %2936  ;;  %2767 = vmatprep.mubr.msk.f32.mxu0 %vm796_vm1, %v2935_v56 }
 0x10d   :  { %v2939_v58 = vpop.eup %2938  ;;  %2819 = vmatprep.mubr.msk.f32.mxu1 %vm796_vm1, %v2937_v57  ;;  %2768 = vmatmul.mubr.msk.f32.gmra.mxu0 %vm796_vm1, %v2931_v52 }
 0x10e   :  { %v2941_v59 = vpop.eup %2940  ;;  %2820 = vmatmul.mubr.msk.f32.gmra.mxu1 %vm796_vm1, %v2933_v55 }
 0x10f   :  { %v2943_v60 = vpop.eup %2942 }
 0x110   :  { %v2945_v61 = vpop.eup %2944  ;;  %2770 = vmatprep.mubr.msk.f32.mxu0 %vm796_vm1, %v2943_v60 }
 0x111   :  { %v2947_v62 = vpop.eup %2946  ;;  %2822 = vmatprep.mubr.msk.f32.mxu1 %vm796_vm1, %v2945_v61  ;;  %2771 = vmatmul.mubr.msk.f32.gmra.mxu0 %vm796_vm1, %v2939_v58 }
 0x112   :  { %v2949_v63 = vpop.eup %2948  ;;  %2823 = vmatmul.mubr.msk.f32.gmra.mxu1 %vm796_vm1, %v2941_v59 }
 0x113   :  { %v2951_v0 = vpop.eup %2950 }
 0x114   :  { %v2953_v1 = vpop.eup %2952  ;;  %2773 = vmatprep.mubr.msk.f32.mxu0 %vm796_vm1, %v2951_v0 }
 0x115   :  { %v2955_v2 = vpop.eup %2954  ;;  %2825 = vmatprep.mubr.msk.f32.mxu1 %vm796_vm1, %v2953_v1  ;;  %2774 = vmatmul.mubr.msk.f32.gmra.mxu0 %vm796_vm1, %v2947_v62 }
 0x116   :  { %v2957_v3 = vpop.eup %2956  ;;  %2826 = vmatmul.mubr.msk.f32.gmra.mxu1 %vm796_vm1, %v2949_v63 }
 0x117   :  { %v2959_v4 = vpop.eup %2958 }
 0x118   :  { %v2961_v5 = vpop.eup %2960  ;;  %2776 = vmatprep.mubr.msk.f32.mxu0 %vm796_vm1, %v2959_v4 }
 0x119   :  { %2828 = vmatprep.mubr.msk.f32.mxu1 %vm796_vm1, %v2961_v5  ;;  %2777 = vmatmul.mubr.msk.f32.gmra.mxu0 %vm796_vm1, %v2955_v2 }
 0x11a   :  { %2829 = vmatmul.mubr.msk.f32.gmra.mxu1 %vm796_vm1, %v2957_v3 }
 0x19d   :  { %v2733_v7 = vpop.f32.mrf.mxu0 }
 0x19e   :  { %v2785_v8 = vpop.f32.mrf.mxu1  ;;  %v965_v13 = vadd.f32 1e-06, %v2733_v7 }
 0x19f   :  { %v959_v9 = vpop.f32.mrf.mxu0  ;;  %v1286_v14 = vadd.f32 1e-06, %v2785_v8 }
 0x1a0   :  { %v1280_v10 = vpop.f32.mrf.mxu1  ;;  %v960_v21 = vadd.f32 1e-06, %v959_v9 }
 0x1a1   :  { %v2736_v11 = vpop.f32.mrf.mxu0  ;;  %v1440_v19 = vmax.f32 %v965_v13, %v1286_v14  ;;  %v1281_v22 = vadd.f32 1e-06, %v1280_v10 }
 0x1a2   :  { %v2788_v12 = vpop.f32.mrf.mxu1  ;;  %v975_v15 = vadd.f32 1e-06, %v2736_v11 }
 0x1a3   :  { %v1296_v16 = vadd.f32 1e-06, %v2788_v12  ;;  %v969_v17 = vpop.f32.mrf.mxu0  ;;  %v1472_v25 = vsub.f32 %v965_v13, %v1440_v19  ;;  %v1568_v26 = vsub.f32 %v1286_v14, %v1440_v19  ;;  %v1439_v30 = vmax.f32 %v960_v21, %v1281_v22 }
 0x1a4   :  { %v1290_v18 = vpop.f32.mrf.mxu1  ;;  %v970_v28 = vadd.f32 1e-06, %v969_v17 }
 0x1a5   :  { %v1442_v20 = vmax.f32 %v975_v15, %v1296_v16  ;;  %v2739_v23 = vpop.f32.mrf.mxu0  ;;  %v1291_v29 = vadd.f32 1e-06, %v1290_v18  ;;  %v1505_v34 = vmul.f32 1.442695, %v1472_v25  ;;  %v1601_v35 = vmul.f32 1.442695, %v1568_v26 }
 0x1a6   :  { %v2791_v24 = vpop.f32.mrf.mxu1  ;;  %v985_v38 = vadd.f32 1e-06, %v2739_v23  ;;  %v1471_v40 = vsub.f32 %v960_v21, %v1439_v30  ;;  %v1567_v44 = vsub.f32 %v1281_v22, %v1439_v30 }
 0x1a7   :  { %v1474_v27 = vsub.f32 %v975_v15, %v1442_v20  ;;  %v1570_v31 = vsub.f32 %v1296_v16, %v1442_v20  ;;  %v979_v32 = vpop.f32.mrf.mxu0  ;;  %v1441_v37 = vmax.f32 %v970_v28, %v1291_v29  ;;  %v1306_v39 = vadd.f32 1e-06, %v2791_v24 }
 0x1a8   :  { %v1300_v33 = vpop.f32.mrf.mxu1  ;;  %2962 = vpow2.f32 %v1505_v34  ;;  %v980_v45 = vadd.f32 1e-06, %v979_v32  ;;  %v1503_v49 = vmul.f32 1.442695, %v1471_v40  ;;  %v1599_v53 = vmul.f32 1.442695, %v1567_v44 }
 0x1a9   :  { %v1509_v36 = vmul.f32 1.442695, %v1474_v27  ;;  %v1605_v41 = vmul.f32 1.442695, %v1570_v31  ;;  %v2742_v42 = vpop.f32.mrf.mxu0  ;;  %v1301_v46 = vadd.f32 1e-06, %v1300_v33  ;;  %2964 = vpow2.f32 %v1601_v35 }
 0x1aa   :  { %v2794_v43 = vpop.f32.mrf.mxu1  ;;  %v1473_v47 = vsub.f32 %v970_v28, %v1441_v37  ;;  %v1444_v48 = vmax.f32 %v985_v38, %v1306_v39  ;;  %v1569_v50 = vsub.f32 %v1291_v29, %v1441_v37  ;;  %v995_v57 = vadd.f32 1e-06, %v2742_v42 }
 0x1ab   :  { %2966 = vpow2.f32 %v1509_v36  ;;  %v989_v51 = vpop.f32.mrf.mxu0  ;;  %v1443_v54 = vmax.f32 %v980_v45, %v1301_v46  ;;  %v1316_v58 = vadd.f32 1e-06, %v2794_v43 }
 0x1ac   :  { %2968 = vpow2.f32 %v1605_v41  ;;  %v1310_v52 = vpop.f32.mrf.mxu1  ;;  %v1507_v55 = vmul.f32 1.442695, %v1473_v47  ;;  %v1476_v56 = vsub.f32 %v985_v38, %v1444_v48  ;;  %v1603_v59 = vmul.f32 1.442695, %v1569_v50 }
 0x1ad   :  { %2970 = vpow2.f32 %v1503_v49  ;;  %v1572_v60 = vsub.f32 %v1306_v39, %v1444_v48  ;;  %v2745_v61 = vpop.f32.mrf.mxu0  ;;  %v1475_v63 = vsub.f32 %v980_v45, %v1443_v54  ;;  %v990_v0 = vadd.f32 1e-06, %v989_v51 }
 0x1ae   :  { %v2797_v62 = vpop.f32.mrf.mxu1  ;;  %2972 = vpow2.f32 %v1599_v53  ;;  %v1311_v1 = vadd.f32 1e-06, %v1310_v52  ;;  %v1513_v2 = vmul.f32 1.442695, %v1476_v56  ;;  %v1446_v3 = vmax.f32 %v995_v57, %v1316_v58 }
 0x1af   :  { %2974 = vpow2.f32 %v1507_v55  ;;  %v1609_v4 = vmul.f32 1.442695, %v1572_v60  ;;  %v1571_v5 = vsub.f32 %v1301_v46, %v1443_v54  ;;  %v999_v6 = vpop.f32.mrf.mxu0  ;;  %v1511_v8 = vmul.f32 1.442695, %v1475_v63 }
 0x1b0   :  { %2976 = vpow2.f32 %v1603_v59  ;;  %v1320_v7 = vpop.f32.mrf.mxu1  ;;  %v1445_v10 = vmax.f32 %v990_v0, %v1311_v1  ;;  %v1005_v11 = vadd.f32 1e-06, %v2745_v61  ;;  %v1326_v12 = vadd.f32 1e-06, %v2797_v62 }
 0x1b1   :  { %2978 = vpow2.f32 %v1513_v2  ;;  %v1478_v14 = vsub.f32 %v995_v57, %v1446_v3  ;;  %v1607_v16 = vmul.f32 1.442695, %v1571_v5  ;;  %v2748_v17 = vpop.f32.mrf.mxu0  ;;  %v1574_v20 = vsub.f32 %v1316_v58, %v1446_v3 }
 0x1b2   :  { %2980 = vpow2.f32 %v1609_v4  ;;  %v2800_v18 = vpop.f32.mrf.mxu1  ;;  %v1000_v21 = vadd.f32 1e-06, %v999_v6  ;;  %v1477_v22 = vsub.f32 %v990_v0, %v1445_v10  ;;  %v1448_v23 = vmax.f32 %v1005_v11, %v1326_v12 }
 0x1b3   :  { %2982 = vpow2.f32 %v1511_v8  ;;  %v1321_v24 = vadd.f32 1e-06, %v1320_v7  ;;  %v1517_v26 = vmul.f32 1.442695, %v1478_v14  ;;  %v1573_v27 = vsub.f32 %v1311_v1, %v1445_v10  ;;  %v1009_v33 = vpop.f32.mrf.mxu0 }
 0x1b4   :  { %v1015_v28 = vadd.f32 1e-06, %v2748_v17  ;;  %v1336_v29 = vadd.f32 1e-06, %v2800_v18  ;;  %2984 = vpow2.f32 %v1607_v16  ;;  %v1613_v32 = vmul.f32 1.442695, %v1574_v20  ;;  %v1330_v34 = vpop.f32.mrf.mxu1 }
 0x1b5   :  { %v3587_v9 = vpop.eup %2962  ;;  %v1515_v36 = vmul.f32 1.442695, %v1477_v22  ;;  %v1480_v37 = vsub.f32 %v1005_v11, %v1448_v23  ;;  %v1447_v38 = vmax.f32 %v1000_v21, %v1321_v24  ;;  %v1611_v39 = vmul.f32 1.442695, %v1573_v27  ;;  %v2751_v47 = vpop.f32.mrf.mxu0 }
 0x1b6   :  { %v3589_v13 = vpop.eup %2964  ;;  %v1576_v40 = vsub.f32 %v1326_v12, %v1448_v23  ;;  %v1450_v41 = vmax.f32 %v1015_v28, %v1336_v29  ;;  %v1010_v43 = vadd.f32 1e-06, %v1009_v33  ;;  %v1331_v44 = vadd.f32 1e-06, %v1330_v34  ;;  %v2803_v48 = vpop.f32.mrf.mxu1 }
 0x1b7   :  { %v1664_v25 = vadd.f32 %v3589_v13, %v3587_v9  ;;  %v1521_v49 = vmul.f32 1.442695, %v1480_v37  ;;  %v1479_v50 = vsub.f32 %v1000_v21, %v1447_v38  ;;  %v1575_v52 = vsub.f32 %v1321_v24, %v1447_v38  ;;  %v1019_v62 = vpop.f32.mrf.mxu0 }
 0x1b8   :  { %v3591_v15 = vpop.eup %2966  ;;  %v1617_v51 = vmul.f32 1.442695, %v1576_v40  ;;  %v1482_v53 = vsub.f32 %v1015_v28, %v1450_v41  ;;  %v1449_v56 = vmax.f32 %v1010_v43, %v1331_v44  ;;  %v1025_v57 = vadd.f32 1e-06, %v2751_v47  ;;  %v1340_v63 = vpop.f32.mrf.mxu1 }
 0x1b9   :  { %v3593_v19 = vpop.eup %2968  ;;  %2986 = vrcp.f32 %v1664_v25  ;;  %v3613_v58 = vadd.f32 1e-06, %v2803_v48  ;;  %v1519_v61 = vmul.f32 1.442695, %v1479_v50  ;;  %v1615_v0 = vmul.f32 1.442695, %v1575_v52  ;;  %v2754_v14 = vpop.f32.mrf.mxu0 }
 0x1ba   :  { %v1666_v30 = vadd.f32 %v3593_v19, %v3591_v15  ;;  %v3599_v31 = vpop.eup %2970  ;;  %2988 = vpow2.f32 %v1517_v26  ;;  %v1578_v1 = vsub.f32 %v1336_v29, %v1450_v41  ;;  %v1525_v2 = vmul.f32 1.442695, %v1482_v53  ;;  %v2806_v16 = vpop.f32.mrf.mxu1 }
 0x1bb   :  { %v3601_v35 = vpop.eup %2972  ;;  %v1481_v3 = vsub.f32 %v1010_v43, %v1449_v56  ;;  %v1452_v4 = vmax.f32 %v1025_v57, %v3613_v58  ;;  %v1020_v6 = vadd.f32 1e-06, %v1019_v62  ;;  %v3622_v7 = vadd.f32 1e-06, %v1340_v63 }
 0x1bc   :  { %v3603_v42 = vpop.eup %2974  ;;  %2990 = vrcp.f32 %v1666_v30  ;;  %v1663_v46 = vadd.f32 %v3601_v35, %v3599_v31  ;;  %v1577_v11 = vsub.f32 %v1331_v44, %v1449_v56  ;;  %v1621_v12 = vmul.f32 1.442695, %v1578_v1  ;;  %v1029_v30 = vpop.f32.mrf.mxu0 }
 0x1bd   :  { %v3605_v45 = vpop.eup %2976  ;;  %2992 = vpow2.f32 %v1613_v32  ;;  %v1523_v21 = vmul.f32 1.442695, %v1481_v3  ;;  %v1484_v22 = vsub.f32 %v1025_v57, %v1452_v4  ;;  %v1451_v25 = vmax.f32 %v1020_v6, %v3622_v7  ;;  %v1350_v32 = vpop.f32.mrf.mxu1 }
 0x1be   :  { %2994 = vpow2.f32 %v1515_v36  ;;  %v3609_v54 = vpop.eup %2978  ;;  %v1665_v55 = vadd.f32 %v3605_v45, %v3603_v42  ;;  %v1035_v26 = vadd.f32 1e-06, %v2754_v14  ;;  %v3633_v27 = vadd.f32 1e-06, %v2806_v16  ;;  %v2757_v43 = vpop.f32.mrf.mxu0 }
 0x1bf   :  { %2996 = vpow2.f32 %v1611_v39  ;;  %v3615_v59 = vpop.eup %2980  ;;  %v1580_v34 = vsub.f32 %v3613_v58, %v1452_v4  ;;  %v1529_v36 = vmul.f32 1.442695, %v1484_v22  ;;  %v1483_v37 = vsub.f32 %v1020_v6, %v1451_v25  ;;  %v2809_v44 = vpop.f32.mrf.mxu1 }
 0x1c0   :  { %2998 = vrcp.f32 %v1663_v46  ;;  %v3617_v60 = vpop.eup %2982  ;;  %v1668_v10 = vadd.f32 %v3615_v59, %v3609_v54  ;;  %v1454_v38 = vmax.f32 %v1035_v26, %v3633_v27  ;;  %v1030_v40 = vadd.f32 1e-06, %v1029_v30  ;;  %v1039_v63 = vpop.f32.mrf.mxu0 }
 0x1c1   :  { %3000 = vpow2.f32 %v1521_v49  ;;  %v3620_v5 = vpop.eup %2984  ;;  %v1351_v41 = vadd.f32 1e-06, %v1350_v32  ;;  %v1579_v48 = vsub.f32 %v3622_v7, %v1451_v25  ;;  %v1625_v52 = vmul.f32 1.442695, %v1580_v34  ;;  %v1360_v62 = vpop.f32.mrf.mxu1 }
 0x1c2   :  { %3002 = vpow2.f32 %v1617_v51  ;;  %v1667_v24 = vadd.f32 %v3620_v5, %v3617_v60  ;;  %v1486_v56 = vsub.f32 %v1035_v26, %v1454_v38  ;;  %v1045_v58 = vadd.f32 1e-06, %v2757_v43  ;;  %v2760_v16 = vpop.f32.mrf.mxu0 }
 0x1c3   :  { %3004 = vrcp.f32 %v1665_v55  ;;  %v1527_v55 = vmul.f32 1.442695, %v1483_v37  ;;  %v1453_v57 = vmax.f32 %v1030_v40, %v1351_v41  ;;  %v1582_v4 = vsub.f32 %v3633_v27, %v1454_v38 }
 0x1c4   :  { %3006 = vpow2.f32 %v1519_v61  ;;  %v3655_v61 = vadd.f32 1e-06, %v2809_v44  ;;  %v3668_v7 = vadd.f32 1e-06, %v1360_v62  ;;  %v1055_v26 = vadd.f32 1e-06, %v2760_v16 }
 0x1c5   :  { %3008 = vpow2.f32 %v1615_v0  ;;  %v1581_v14 = vsub.f32 %v1351_v41, %v1453_v57  ;;  %v1629_v22 = vmul.f32 1.442695, %v1582_v4 }
 0x1c6   :  { %v2987_v8 = vpop.eup %2986  ;;  %3010 = vpow2.f32 %v1525_v2 }
 0x1c7   :  { %v1792_v17 = vmul.f32 %v2987_v8, %v3589_v13  ;;  %v1760_v18 = vmul.f32 %v2987_v8, %v3587_v9  ;;  %v3628_v20 = vpop.eup %2988  ;;  %v1619_v13 = vmul.f32 1.442695, %v1577_v11  ;;  %3012 = vrcp.f32 %v1668_v10 }
 0x1c8   :  { %3014 = vpow2.f32 %v1621_v12  ;;  %v1040_v8 = vadd.f32 1e-06, %v1039_v63  ;;  %v1485_v10 = vsub.f32 %v1030_v40, %v1453_v57  ;;  %v1627_v32 = vmul.f32 1.442695, %v1581_v14 }
 0x1c9   :  { %v2991_v23 = vpop.eup %2990  ;;  %2022 = vperm.xlu1 %2833, %v1792_v17   ;;  %1830 = vperm.xlu0 %2832, %v1760_v18   ;;  %3016 = vpow2.f32 %v1523_v21  ;;  %v2812_v17 = vpop.f32.mrf.mxu1 }
 0x1ca   :  { %v3635_v28 = vpop.eup %2992  ;;  %v1762_v9 = vmul.f32 %v2991_v23, %v3591_v15  ;;  %3018 = vrcp.f32 %v1667_v24  ;;  %v1794_v50 = vmul.f32 %v2991_v23, %v3593_v19  ;;  %v1455_v25 = vmax.f32 %v1040_v8, %v3668_v7 }
 0x1cb   :  { %v3638_v29 = vpop.eup %2994  ;;  %v1670_v15 = vadd.f32 %v3635_v28, %v3628_v20  ;;  %3020 = vpow2.f32 %v1619_v13  ;;  %v3680_v27 = vadd.f32 1e-06, %v2812_v17  ;;  %v1370_v34 = vpop.f32.mrf.mxu1 }
 0x1cc   :  { %v3640_v33 = vpop.eup %2996  ;;  %3022 = vpow2.f32 %v1529_v36  ;;  %v1049_v36 = vpop.f32.mrf.mxu0  ;;  %v3692_v44 = vadd.f32 1e-06, %v1370_v34 }
 0x1cd   :  { %1840 = vperm.xlu1 %2833, %v1762_v9   ;;  %v2999_v39 = vpop.eup %2998  ;;  %v1669_v47 = vadd.f32 %v3640_v33, %v3638_v29  ;;  %3024 = vrcp.f32 %v1670_v15  ;;  %v1531_v9 = vmul.f32 1.442695, %v1485_v10  ;;  %v1487_v15 = vsub.f32 %v1040_v8, %v1455_v25 }
 0x1ce   :  { %v3646_v46 = vpop.eup %3000  ;;  %v1759_v49 = vmul.f32 %v2999_v39, %v3599_v31  ;;  %v1623_v31 = vmul.f32 1.442695, %v1579_v48  ;;  %v1791_v19 = vmul.f32 %v2999_v39, %v3601_v35  ;;  %v1533_v35 = vmul.f32 1.442695, %v1486_v56 }
 0x1cf   :  { %v3653_v51 = vpop.eup %3002  ;;  %3026 = vrcp.f32 %v1669_v47  ;;  %v1458_v40 = vmax.f32 %v1055_v26, %v3680_v27 }
 0x1d0   :  { %v3005_v53 = vpop.eup %3004  ;;  %1825 = vperm.xlu0 %2832, %v1759_v49   ;;  %v1672_v3 = vadd.f32 %v3653_v51, %v3646_v46  ;;  %3028 = vpow2.f32 %v1625_v52  ;;  %v1583_v49 = vsub.f32 %v3668_v7, %v1455_v25 }
 0x1d1   :  { %2032 = vperm.xlu1 %2833, %v1794_v50   ;;  %v3657_v0 = vpop.eup %3006  ;;  %v1761_v1 = vmul.f32 %v3005_v53, %v3603_v42  ;;  %3030 = vpow2.f32 %v1527_v55  ;;  %v1456_v42 = vmax.f32 %v1045_v58, %v3655_v61  ;;  %v1793_v18 = vmul.f32 %v3005_v53, %v3605_v45  ;;  %v2815_v50 = vpop.f32.mrf.mxu1 }
 0x1d2   :  { %v3661_v2 = vpop.eup %3008  ;;  %3032 = vpow2.f32 %v1623_v31  ;;  %v3702_v31 = vadd.f32 1e-06, %v2815_v50  ;;  %v1586_v8 = vsub.f32 %v3680_v27, %v1458_v40 }
 0x1d3   :  { %v3666_v6 = vpop.eup %3010  ;;  %v1671_v12 = vadd.f32 %v3661_v2, %v3657_v0  ;;  %3034 = vrcp.f32 %v1672_v3  ;;  %v1488_v30 = vsub.f32 %v1045_v58, %v1456_v42  ;;  %v1584_v38 = vsub.f32 %v3655_v61, %v1456_v42  ;;  %v1380_v3 = vpop.f32.mrf.mxu1 }
 0x1d4   :  { %2017 = vperm.xlu0 %2832, %v1791_v19   ;;  %v3013_v11 = vpop.eup %3012  ;;  %3036 = vpow2.f32 %v1533_v35  ;;  %v1535_v58 = vmul.f32 1.442695, %v1487_v15  ;;  %v1490_v61 = vsub.f32 %v1055_v26, %v1458_v40  ;;  %v1637_v26 = vmul.f32 1.442695, %v1586_v8 }
 0x1d5   :  { %1835 = vperm.xlu1 %2833, %v1761_v1   ;;  %v3674_v21 = vpop.eup %3014  ;;  %v1764_v23 = vmul.f32 %v3013_v11, %v3609_v54  ;;  %3038 = vrcp.f32 %v1671_v12  ;;  %v1796_v39 = vmul.f32 %v3013_v11, %v3615_v59  ;;  %v1537_v43 = vmul.f32 1.442695, %v1488_v30  ;;  %v2763_v59 = vpop.f32.mrf.mxu0 }
 0x1d6   :  { %v3677_v24 = vpop.eup %3016  ;;  %v1674_v37 = vadd.f32 %v3674_v21, %v3666_v6  ;;  %3040 = vpow2.f32 %v1629_v22  ;;  %v1633_v55 = vmul.f32 1.442695, %v1584_v38  ;;  %v1065_v63 = vadd.f32 1e-06, %v2763_v59  ;;  %v2818_v17 = vpop.f32.mrf.mxu1 }
 0x1d7   :  { %v3019_v13 = vpop.eup %3018  ;;  %3042 = vpow2.f32 %v1531_v9  ;;  %v1059_v1 = vpop.f32.mrf.mxu0  ;;  %v1541_v42 = vmul.f32 1.442695, %v1490_v61  ;;  %v3725_v30 = vadd.f32 1e-06, %v2818_v17 }
 0x1d8   :  { %2027 = vperm.xlu0 %2832, %v1793_v18   ;;  %v3682_v45 = vpop.eup %3020  ;;  %v1763_v54 = vmul.f32 %v3019_v13, %v3617_v60  ;;  %v1050_v60 = vadd.f32 1e-06, %v1049_v36  ;;  %3044 = vpow2.f32 %v1627_v32  ;;  %v1795_v52 = vmul.f32 %v3019_v13, %v3620_v5 }
 0x1d9   :  { %1850 = vperm.xlu1 %2833, %v1764_v23   ;;  %v3690_v41 = vpop.eup %3022  ;;  %v1673_v48 = vadd.f32 %v3682_v45, %v3677_v24  ;;  %3046 = vrcp.f32 %v1674_v37  ;;  %v1631_v5 = vmul.f32 1.442695, %v1583_v49  ;;  %v1460_v12 = vmax.f32 %v1065_v63, %v3702_v31  ;;  %v2766_v16 = vpop.f32.mrf.mxu0 }
 0x1da   :  { %v3025_v47 = vpop.eup %3024  ;;  %3048 = vpow2.f32 %v1537_v43  ;;  %v1457_v62 = vmax.f32 %v1050_v60, %v3692_v44  ;;  %v1060_v14 = vadd.f32 1e-06, %v1059_v1  ;;  %v1075_v9 = vadd.f32 1e-06, %v2766_v16  ;;  %v1390_v37 = vpop.f32.mrf.mxu1 }
 0x1db   :  { %v1766_v56 = vmul.f32 %v3025_v47, %v3628_v20  ;;  %3050 = vrcp.f32 %v1673_v48  ;;  %v1798_v35 = vmul.f32 %v3025_v47, %v3635_v28  ;;  %v1492_v34 = vsub.f32 %v1065_v63, %v1460_v12 }
 0x1dc   :  { %1845 = vperm.xlu0 %2832, %v1763_v54   ;;  %v3027_v53 = vpop.eup %3026  ;;  %3052 = vpow2.f32 %v1633_v55  ;;  %v1489_v11 = vsub.f32 %v1050_v60, %v1457_v62  ;;  %v1585_v28 = vsub.f32 %v3692_v44, %v1457_v62  ;;  %v1069_v54 = vpop.f32.mrf.mxu0  ;;  %v1588_v40 = vsub.f32 %v3702_v31, %v1460_v12 }
 0x1dd   :  { %2042 = vperm.xlu1 %2833, %v1796_v39   ;;  %v3699_v57 = vpop.eup %3028  ;;  %v1765_v20 = vmul.f32 %v3027_v53, %v3638_v29  ;;  %3054 = vpow2.f32 %v1535_v58  ;;  %v3714_v29 = vadd.f32 1e-06, %v1380_v3  ;;  %v1797_v23 = vmul.f32 %v3027_v53, %v3640_v33  ;;  %v2821_v53 = vpop.f32.mrf.mxu1 }
 0x1de   :  { %v3704_v19 = vpop.eup %3030  ;;  %v1676_v7 = vadd.f32 %v3699_v57, %v3690_v41  ;;  %3056 = vpow2.f32 %v1631_v5  ;;  %v1539_v32 = vmul.f32 1.442695, %v1489_v11  ;;  %v1635_v38 = vmul.f32 1.442695, %v1585_v28 }
 0x1df   :  { %v3707_v4 = vpop.eup %3032  ;;  %v1459_v36 = vmax.f32 %v1060_v14, %v3714_v29  ;;  %v1462_v60 = vmax.f32 %v1075_v9, %v3725_v30  ;;  %v1070_v47 = vadd.f32 1e-06, %v1069_v54  ;;  %v3738_v48 = vadd.f32 1e-06, %v1390_v37  ;;  %v1400_v8 = vpop.f32.mrf.mxu1 }
 0x1e0   :  { %2037 = vperm.xlu0 %2832, %v1795_v52   ;;  %v3035_v10 = vpop.eup %3034  ;;  %v1675_v22 = vadd.f32 %v3707_v4, %v3704_v19  ;;  %3058 = vrcp.f32 %v1676_v7  ;;  %v1641_v58 = vmul.f32 1.442695, %v1588_v40 }
 0x1e1   :  { %1860 = vperm.xlu1 %2833, %v1766_v56   ;;  %v3716_v18 = vpop.eup %3036  ;;  %v1768_v27 = vmul.f32 %v3035_v10, %v3646_v46  ;;  %3060 = vpow2.f32 %v1541_v42  ;;  %v1800_v43 = vmul.f32 %v3035_v10, %v3653_v51  ;;  %v1491_v49 = vsub.f32 %v1060_v14, %v1459_v36  ;;  %v2769_v51 = vpop.f32.mrf.mxu0 }
 0x1e2   :  { %v3039_v25 = vpop.eup %3038  ;;  %3062 = vrcp.f32 %v1675_v22  ;;  %v1587_v52 = vsub.f32 %v3714_v29, %v1459_v36  ;;  %v1494_v63 = vsub.f32 %v1075_v9, %v1462_v60  ;;  %v1461_v31 = vmax.f32 %v1070_v47, %v3738_v48  ;;  %v2824_v28 = vpop.f32.mrf.mxu1 }
 0x1e3   :  { %v3723_v13 = vpop.eup %3040  ;;  %v1767_v46 = vmul.f32 %v3039_v25, %v3657_v0  ;;  %3064 = vpow2.f32 %v1637_v26  ;;  %v1545_v0 = vmul.f32 1.442695, %v1492_v34  ;;  %v1799_v55 = vmul.f32 %v3039_v25, %v3661_v2  ;;  %v1079_v7 = vpop.f32.mrf.mxu0 }
 0x1e4   :  { %1855 = vperm.xlu0 %2832, %v1765_v20   ;;  %v3728_v33 = vpop.eup %3042  ;;  %v1678_v15 = vadd.f32 %v3723_v13, %v3716_v18  ;;  %3066 = vpow2.f32 %v1539_v32  ;;  %v1543_v1 = vmul.f32 1.442695, %v1491_v49  ;;  %v1085_v3 = vadd.f32 1e-06, %v2769_v51 }
 0x1e5   :  { %2052 = vperm.xlu1 %2833, %v1798_v35   ;;  %v3731_v39 = vpop.eup %3044  ;;  %3068 = vpow2.f32 %v1635_v38  ;;  %v3752_v20 = vadd.f32 1e-06, %v2821_v53  ;;  %v1639_v2 = vmul.f32 1.442695, %v1587_v52  ;;  %v1590_v42 = vsub.f32 %v3725_v30, %v1462_v60  ;;  %v2772_v22 = vpop.f32.mrf.mxu0 }
 0x1e6   :  { %v3047_v44 = vpop.eup %3046  ;;  %v1677_v50 = vadd.f32 %v3731_v39, %v3728_v33  ;;  %3070 = vrcp.f32 %v1678_v15  ;;  %v1549_v14 = vmul.f32 1.442695, %v1494_v63  ;;  %v1493_v29 = vsub.f32 %v1070_v47, %v1461_v31  ;;  %v1410_v15 = vpop.f32.mrf.mxu1 }
 0x1e7   :  { %v3740_v59 = vpop.eup %3048  ;;  %v1770_v61 = vmul.f32 %v3047_v44, %v3666_v6  ;;  %3072 = vpow2.f32 %v1545_v0  ;;  %v1802_v11 = vmul.f32 %v3047_v44, %v3674_v21  ;;  %v1464_v16 = vmax.f32 %v1085_v3, %v3752_v20 }
 0x1e8   :  { %2047 = vperm.xlu0 %2832, %v1797_v23   ;;  %v3051_v56 = vpop.eup %3050  ;;  %3074 = vrcp.f32 %v1677_v50  ;;  %v1080_v17 = vadd.f32 1e-06, %v1079_v7  ;;  %v1589_v21 = vsub.f32 %v3738_v48, %v1461_v31  ;;  %v1645_v9 = vmul.f32 1.442695, %v1590_v42 }
 0x1e9   :  { %1870 = vperm.xlu1 %2833, %v1768_v27   ;;  %v3747_v62 = vpop.eup %3052  ;;  %v1769_v6 = vmul.f32 %v3051_v56, %v3677_v24  ;;  %3076 = vpow2.f32 %v1641_v58  ;;  %v3762_v24 = vadd.f32 1e-06, %v1400_v8  ;;  %v1801_v26 = vmul.f32 %v3051_v56, %v3682_v45  ;;  %v2827_v56 = vpop.f32.mrf.mxu1 }
 0x1ea   :  { %v3750_v5 = vpop.eup %3054  ;;  %v1680_v10 = vadd.f32 %v3747_v62, %v3740_v59  ;;  %3078 = vpow2.f32 %v1543_v1  ;;  %v1547_v34 = vmul.f32 1.442695, %v1493_v29  ;;  %v1496_v36 = vsub.f32 %v1085_v3, %v1464_v16 }
 0x1eb   :  { %v3755_v35 = vpop.eup %3056  ;;  %3080 = vpow2.f32 %v1639_v2  ;;  %v1463_v54 = vmax.f32 %v1080_v17, %v3762_v24  ;;  %v1095_v37 = vadd.f32 1e-06, %v2772_v22  ;;  %v3774_v38 = vadd.f32 1e-06, %v2824_v28  ;;  %v1420_v42 = vpop.f32.mrf.mxu1 }
 0x1ec   :  { %1865 = vperm.xlu0 %2832, %v1767_v46   ;;  %v1679_v25 = vadd.f32 %v3755_v35, %v3750_v5  ;;  %3082 = vrcp.f32 %v1680_v10  ;;  %v1089_v46 = vpop.f32.mrf.mxu0  ;;  %v1643_v40 = vmul.f32 1.442695, %v1589_v21  ;;  %v1592_v60 = vsub.f32 %v3752_v20, %v1464_v16 }
 0x1ed   :  { %2062 = vperm.xlu1 %2833, %v1800_v43   ;;  %v3059_v12 = vpop.eup %3058  ;;  %3084 = vpow2.f32 %v1549_v14  ;;  %v1090_v0 = vadd.f32 1e-06, %v1089_v46  ;;  %v3785_v49 = vadd.f32 1e-06, %v1410_v15  ;;  %v1553_v50 = vmul.f32 1.442695, %v1496_v36 }
 0x1ee   :  { %v3764_v23 = vpop.eup %3060  ;;  %v1772_v30 = vmul.f32 %v3059_v12, %v3690_v41  ;;  %3086 = vrcp.f32 %v1679_v25  ;;  %v1804_v47 = vmul.f32 %v3059_v12, %v3699_v57  ;;  %v1495_v52 = vsub.f32 %v1080_v17, %v1463_v54  ;;  %v2775_v57 = vpop.f32.mrf.mxu0 }
 0x1ef   :  { %v3063_v27 = vpop.eup %3062  ;;  %3088 = vpow2.f32 %v1645_v9  ;;  %v1649_v63 = vmul.f32 1.442695, %v1592_v60  ;;  %v1465_v3 = vmax.f32 %v1090_v0, %v3785_v49  ;;  %v1105_v20 = vadd.f32 1e-06, %v2775_v57 }
 0x1f0   :  { %2057 = vperm.xlu0 %2832, %v1799_v55   ;;  %v3771_v32 = vpop.eup %3064  ;;  %v1771_v41 = vmul.f32 %v3063_v27, %v3704_v19  ;;  %3090 = vpow2.f32 %v1547_v34  ;;  %v1466_v19 = vmax.f32 %v1095_v37, %v3774_v38  ;;  %v1591_v55 = vsub.f32 %v3762_v24, %v1463_v54  ;;  %v1099_v10 = vpop.f32.mrf.mxu0 }
 0x1f1   :  { %1880 = vperm.xlu1 %2833, %v1770_v61   ;;  %v3776_v45 = vpop.eup %3066  ;;  %v1682_v44 = vadd.f32 %v3771_v32, %v3764_v23  ;;  %3092 = vpow2.f32 %v1643_v40  ;;  %v1803_v58 = vmul.f32 %v3063_v27, %v3707_v4  ;;  %v3798_v2 = vadd.f32 1e-06, %v2827_v56 }
 0x1f2   :  { %v3779_v43 = vpop.eup %3068  ;;  %v1551_v7 = vmul.f32 1.442695, %v1495_v52  ;;  %v1498_v8 = vsub.f32 %v1095_v37, %v1466_v19  ;;  %v1647_v4 = vmul.f32 1.442695, %v1591_v55  ;;  %v1594_v14 = vsub.f32 %v3774_v38, %v1466_v19  ;;  %v2778_v27 = vpop.f32.mrf.mxu0 }
 0x1f3   :  { %v3071_v48 = vpop.eup %3070  ;;  %v1681_v53 = vadd.f32 %v3779_v43, %v3776_v45  ;;  %3094 = vrcp.f32 %v1682_v44  ;;  %v1497_v17 = vsub.f32 %v1090_v0, %v1465_v3  ;;  %v1468_v24 = vmax.f32 %v1105_v20, %v3798_v2 }
 0x1f4   :  { %1875 = vperm.xlu0 %2832, %v1769_v6   ;;  %v3788_v51 = vpop.eup %3072  ;;  %v1774_v31 = vmul.f32 %v3071_v48, %v3716_v18  ;;  %3096 = vpow2.f32 %v1553_v50  ;;  %v1806_v29 = vmul.f32 %v3071_v48, %v3723_v13  ;;  %v1100_v28 = vadd.f32 1e-06, %v1099_v10  ;;  %v2830_v13 = vpop.f32.mrf.mxu1 }
 0x1f5   :  { %2072 = vperm.xlu1 %2833, %v1802_v11   ;;  %v3075_v61 = vpop.eup %3074  ;;  %3098 = vrcp.f32 %v1681_v53  ;;  %v1421_v25 = vadd.f32 1e-06, %v1420_v42  ;;  %v1653_v34 = vmul.f32 1.442695, %v1594_v14  ;;  %v1555_v37 = vmul.f32 1.442695, %v1497_v17 }
 0x1f6   :  { %v3795_v1 = vpop.eup %3076  ;;  %v1773_v18 = vmul.f32 %v3075_v61, %v3728_v33  ;;  %3100 = vpow2.f32 %v1649_v63  ;;  %v1557_v33 = vmul.f32 1.442695, %v1498_v8  ;;  %v1805_v9 = vmul.f32 %v3075_v61, %v3731_v39  ;;  %v1430_v60 = vpop.f32.mrf.mxu1 }
 0x1f7   :  { %v3800_v6 = vpop.eup %3078  ;;  %v1684_v12 = vadd.f32 %v3795_v1, %v3788_v51  ;;  %3102 = vpow2.f32 %v1551_v7  ;;  %v1500_v38 = vsub.f32 %v1105_v20, %v1468_v24  ;;  %v1467_v46 = vmax.f32 %v1100_v28, %v1421_v25  ;;  %v1109_v39 = vpop.f32.mrf.mxu0 }
 0x1f8   :  { %2067 = vperm.xlu0 %2832, %v1801_v26   ;;  %v3803_v11 = vpop.eup %3080  ;;  %3104 = vpow2.f32 %v1647_v4  ;;  %v1593_v26 = vsub.f32 %v3785_v49, %v1465_v3  ;;  %v1115_v15 = vadd.f32 1e-06, %v2778_v27  ;;  %v1436_v40 = vadd.f32 1e-06, %v2830_v13 }
 0x1f9   :  { %1890 = vperm.xlu1 %2833, %v1772_v30   ;;  %v3083_v16 = vpop.eup %3082  ;;  %v1683_v21 = vadd.f32 %v3803_v11, %v3800_v6  ;;  %3106 = vrcp.f32 %v1684_v12  ;;  %v1596_v0 = vsub.f32 %v3798_v2, %v1468_v24  ;;  %v1561_v52 = vmul.f32 1.442695, %v1500_v38 }
 0x1fa   :  { %v3810_v22 = vpop.eup %3084  ;;  %v1776_v36 = vmul.f32 %v3083_v16, %v3740_v59  ;;  %3108 = vpow2.f32 %v1557_v33  ;;  %v1651_v44 = vmul.f32 1.442695, %v1593_v26  ;;  %v1808_v49 = vmul.f32 %v3083_v16, %v3747_v62 }
 0x1fb   :  { %v3087_v30 = vpop.eup %3086  ;;  %3110 = vrcp.f32 %v1683_v21  ;;  %v1499_v19 = vsub.f32 %v1100_v28, %v1467_v46  ;;  %v1470_v53 = vmax.f32 %v1115_v15, %v1436_v40  ;;  %v1431_v55 = vadd.f32 1e-06, %v1430_v60 }
 0x1fc   :  { %1885 = vperm.xlu0 %2832, %v1771_v41   ;;  %v3817_v54 = vpop.eup %3088  ;;  %3112 = vpow2.f32 %v1653_v34  ;;  %v1110_v57 = vadd.f32 1e-06, %v1109_v39  ;;  %v1807_v61 = vmul.f32 %v3087_v30, %v3755_v35  ;;  %v1657_v62 = vmul.f32 1.442695, %v1596_v0 }
 0x1fd   :  { %2082 = vperm.xlu1 %2833, %v1804_v47   ;;  %v3819_v41 = vpop.eup %3090  ;;  %v1775_v47 = vmul.f32 %v3087_v30, %v3750_v5  ;;  %v1686_v48 = vadd.f32 %v3817_v54, %v3810_v22  ;;  %3114 = vpow2.f32 %v1555_v37  ;;  %v1559_v20 = vmul.f32 1.442695, %v1499_v19 }
 0x1fe   :  { %v3822_v59 = vpop.eup %3092  ;;  %3116 = vpow2.f32 %v1651_v44  ;;  %v1502_v2 = vsub.f32 %v1115_v15, %v1470_v53  ;;  %v1469_v7 = vmax.f32 %v1110_v57, %v1431_v55  ;;  %v1598_v42 = vsub.f32 %v1436_v40, %v1470_v53 }
 0x1ff   :  { %v1685_v56 = vadd.f32 %v3822_v59, %v3819_v41  ;;  %3118 = vrcp.f32 %v1686_v48 }
 0x200   :  { %2077 = vperm.xlu0 %2832, %v1803_v58   ;;  %v3095_v50 = vpop.eup %3094  ;;  %v1595_v58 = vsub.f32 %v1421_v25, %v1467_v46  ;;  %3120 = vpow2.f32 %v1561_v52  ;;  %v1565_v14 = vmul.f32 1.442695, %v1502_v2  ;;  %v1597_v17 = vsub.f32 %v1431_v55, %v1469_v7 }
 0x201   :  { %1900 = vperm.xlu1 %2833, %v1774_v31   ;;  %v3828_v5 = vpop.eup %3096  ;;  %v1778_v31 = vmul.f32 %v3095_v50, %v3764_v23  ;;  %3122 = vrcp.f32 %v1685_v56  ;;  %v1661_v28 = vmul.f32 1.442695, %v1598_v42 }
 0x202   :  { %v3099_v63 = vpop.eup %3098  ;;  %v1655_v4 = vmul.f32 1.442695, %v1595_v58  ;;  %3124 = vpow2.f32 %v1657_v62  ;;  %v1659_v27 = vmul.f32 1.442695, %v1597_v17 }
 0x203   :  { %v3834_v3 = vpop.eup %3100  ;;  %v1777_v10 = vmul.f32 %v3099_v63, %v3776_v45  ;;  %3126 = vpow2.f32 %v1559_v20  ;;  %v1809_v24 = vmul.f32 %v3099_v63, %v3779_v43 }
 0x204   :  { %1895 = vperm.xlu0 %2832, %v1773_v18   ;;  %v3836_v8 = vpop.eup %3102  ;;  %v1688_v23 = vadd.f32 %v3834_v3, %v3828_v5  ;;  %v1810_v18 = vmul.f32 %v3095_v50, %v3771_v32  ;;  %3128 = vpow2.f32 %v1655_v4 }
 0x205   :  { %2092 = vperm.xlu1 %2833, %v1806_v29   ;;  %v3839_v35 = vpop.eup %3104  ;;  %v1501_v29 = vsub.f32 %v1110_v57, %v1469_v7 }
 0x206   :  { %v3107_v12 = vpop.eup %3106  ;;  %v1687_v45 = vadd.f32 %v3839_v35, %v3836_v8  ;;  %3130 = vrcp.f32 %v1688_v23 }
 0x207   :  { %v3844_v16 = vpop.eup %3108  ;;  %v1780_v25 = vmul.f32 %v3107_v12, %v3788_v51  ;;  %3132 = vpow2.f32 %v1565_v14  ;;  %v1563_v26 = vmul.f32 1.442695, %v1501_v29  ;;  %v1812_v30 = vmul.f32 %v3107_v12, %v3795_v1  ;;  %v3154_v14 = vld [vmem:[%s4384_s1 + $0x8] sm:$0xff] }
 0x208   :  { %2087 = vperm.xlu0 %2832, %v1805_v9   ;;  %v3111_v33 = vpop.eup %3110  ;;  %3134 = vrcp.f32 %v1687_v45 }
 0x209   :  { %1910 = vperm.xlu1 %2833, %v1776_v36   ;;  %v3850_v32 = vpop.eup %3112  ;;  %v1779_v13 = vmul.f32 %v3111_v33, %v3800_v6  ;;  %3136 = vpow2.f32 %v1661_v28  ;;  %v1811_v37 = vmul.f32 %v3111_v33, %v3803_v11 }
 0x20a   :  { %v3115_v21 = vpop.eup %3114  ;;  %v1690_v43 = vadd.f32 %v3850_v32, %v3844_v16  ;;  %3138 = vpow2.f32 %v1563_v26 }
 0x20b   :  { %v3117_v9 = vpop.eup %3116  ;;  %3140 = vpow2.f32 %v1659_v27  ;;  %v3157_v27 = vld [vmem:[%s4384_s1 + $0x18] sm:$0xff] }
 0x20c   :  { %1905 = vperm.xlu0 %2832, %v1775_v47   ;;  %v3119_v51 = vpop.eup %3118  ;;  %v1689_v36 = vadd.f32 %v3117_v9, %v3115_v21  ;;  %3142 = vrcp.f32 %v1690_v43 }
 0x20d   :  { %2102 = vperm.xlu1 %2833, %v1808_v49   ;;  %v3121_v34 = vpop.eup %3120  ;;  %v1782_v6 = vmul.f32 %v3119_v51, %v3810_v22  ;;  %v1814_v60 = vmul.f32 %v3119_v51, %v3817_v54 }
 0x20e   :  { %v3123_v38 = vpop.eup %3122  ;;  %3144 = vrcp.f32 %v1689_v36 }
 0x20f   :  { %v3125_v46 = vpop.eup %3124  ;;  %v1781_v40 = vmul.f32 %v3123_v38, %v3819_v41  ;;  %v1813_v48 = vmul.f32 %v3123_v38, %v3822_v59 }
 0x210   :  { %2097 = vperm.xlu0 %2832, %v1807_v61   ;;  %v3127_v15 = vpop.eup %3126  ;;  %v1692_v44 = vadd.f32 %v3125_v46, %v3121_v34 }
 0x211   :  { %1920 = vperm.xlu1 %2833, %v1778_v31   ;;  %v3129_v1 = vpop.eup %3128 }
 0x212   :  { %v1691_v11 = vadd.f32 %v3129_v1, %v3127_v15  ;;  %3146 = vrcp.f32 %v1692_v44  ;;  %v3161_v44 = vld [vmem:[%s4384_s1 + $0x10] sm:$0xff] }
 0x213   :  { %v3131_v39 = vpop.eup %3130 }
 0x214   :  { %1915 = vperm.xlu0 %2832, %v1777_v10   ;;  %v3133_v47 = vpop.eup %3132  ;;  %v1784_v0 = vmul.f32 %v3131_v39, %v3828_v5  ;;  %3148 = vrcp.f32 %v1691_v11  ;;  %v1816_v19 = vmul.f32 %v3131_v39, %v3834_v3  ;;  %v2271_v3 = vlaneseq }
 0x215   :  { %2112 = vperm.xlu1 %2833, %v1810_v18   ;;  %v3135_v22 = vpop.eup %3134 }
 0x216   :  { %v3137_v49 = vpop.eup %3136  ;;  %v1783_v50 = vmul.f32 %v3135_v22, %v3836_v8  ;;  %v1815_v59 = vmul.f32 %v3135_v22, %v3839_v35  ;;  %v3867_v8 = vand.u32 127, %v2271_v3  ;;  %v3167_v3 = vld [vmem:[%s4384_s1 + $0x38] sm:$0xff] }
 0x217   :  { %v3139_v41 = vpop.eup %3138  ;;  %v1694_v54 = vadd.f32 %v3137_v49, %v3133_v47 }
 0x218   :  { %2107 = vperm.xlu0 %2832, %v1809_v24   ;;  %v3141_v52 = vpop.eup %3140  ;;  %vm2273_vm2 = vcmp.eq.s32.totalorder %v3867_v8, 0 }
 0x219   :  { %1930 = vperm.xlu1 %2833, %v1780_v25   ;;  %v3143_v53 = vpop.eup %3142  ;;  %v1693_v55 = vadd.f32 %v3141_v52, %v3139_v41  ;;  %3150 = vrcp.f32 %v1694_v54 }
 0x21a   :  { %v1786_v5 = vmul.f32 %v3143_v53, %v3844_v16  ;;  %v1818_v58 = vmul.f32 %v3143_v53, %v3850_v32  ;;  %v3155_v16 = vld [vmem:[%s4383_s0 + $0x8] sm:$0xff]  ;;  %v3164_v53 = vld [vmem:[%s4383_s0 + $0x20] sm:$0xff] }
 0x21b   :  { %v3145_v57 = vpop.eup %3144  ;;  %3152 = vrcp.f32 %v1693_v55 }
 0x21c   :  { %1925 = vperm.xlu0 %2832, %v1779_v13   ;;  %v1785_v56 = vmul.f32 %v3145_v57, %v3115_v21  ;;  %v1817_v63 = vmul.f32 %v3145_v57, %v3117_v9  ;;  %v3156_v21 = vld [vmem:[%s4383_s0 + $0x18] sm:$0xff] }
 0x21d   :  { %2122 = vperm.xlu1 %2833, %v1812_v30  }
 0x21f   :  { %v3147_v61 = vpop.eup %3146 }
 0x220   :  { %2117 = vperm.xlu0 %2832, %v1811_v37   ;;  %v1788_v31 = vmul.f32 %v3147_v61, %v3121_v34  ;;  %v1820_v2 = vmul.f32 %v3147_v61, %v3125_v46  ;;  %v3158_v34 = vld [vmem:[%s4383_s0] sm:$0xff] }
 0x221   :  { %1940 = vperm.xlu1 %2833, %v1782_v6   ;;  %v3149_v62 = vpop.eup %3148  ;;  %v3159_v37 = vld [vmem:[%s4384_s1] sm:$0xff] }
 0x222   :  { %v1787_v20 = vmul.f32 %v3149_v62, %v3127_v15  ;;  %v1819_v4 = vmul.f32 %v3149_v62, %v3129_v1  ;;  %v3160_v15 = vld [vmem:[%s4383_s0 + $0x10] sm:$0xff]  ;;  %v3166_v62 = vld [vmem:[%s4383_s0 + $0x38] sm:$0xff] }
 0x224   :  { %1935 = vperm.xlu0 %2832, %v1781_v40  }
 0x225   :  { %2132 = vperm.xlu1 %2833, %v1814_v60  }
 0x226   :  { %v3151_v7 = vpop.eup %3150 }
 0x227   :  { %v1790_v35 = vmul.f32 %v3151_v7, %v3133_v47  ;;  %v1822_v12 = vmul.f32 %v3151_v7, %v3137_v49 }
 0x228   :  { %2127 = vperm.xlu0 %2832, %v1813_v48   ;;  %v3153_v10 = vpop.eup %3152 }
 0x229   :  { %1950 = vperm.xlu1 %2833, %v1784_v0   ;;  %v1789_v23 = vmul.f32 %v3153_v10, %v3139_v41  ;;  %v1821_v33 = vmul.f32 %v3153_v10, %v3141_v52  ;;  %v3162_v0 = vld [vmem:[%s4383_s0 + $0x28] sm:$0xff]  ;;  %v3168_v10 = vld [vmem:[%s4383_s0 + $0x30] sm:$0xff] }
 0x22a   :  { %v3163_v41 = vld [vmem:[%s4384_s1 + $0x28] sm:$0xff] }
 0x22c   :  { %1945 = vperm.xlu0 %2832, %v1783_v50  }
 0x22d   :  { %2142 = vperm.xlu1 %2833, %v1816_v19  }
 0x230   :  { %2137 = vperm.xlu0 %2832, %v1815_v59   ;;  %v3165_v59 = vld [vmem:[%s4384_s1 + $0x20] sm:$0xff] }
 0x231   :  { %1960 = vperm.xlu1 %2833, %v1786_v5  }
 0x234   :  { %1955 = vperm.xlu0 %2832, %v1785_v56  }
 0x235   :  { %2152 = vperm.xlu1 %2833, %v1818_v58  }
 0x238   :  { %2147 = vperm.xlu0 %2832, %v1817_v63  }
 0x239   :  { %1970 = vperm.xlu1 %2833, %v1788_v31  }
 0x23c   :  { %1965 = vperm.xlu0 %2832, %v1787_v20  }
 0x23d   :  { %2162 = vperm.xlu1 %2833, %v1820_v2  }
 0x240   :  { %2157 = vperm.xlu0 %2832, %v1819_v4  }
 0x241   :  { %1980 = vperm.xlu1 %2833, %v1790_v35  }
 0x244   :  { %v2023_v42 = vpop.permute.xlu1 %2022  ;;  %v1831_v18 = vpop.permute.xlu0 %1830  ;;  %1975 = vperm.xlu0 %2832, %v1789_v23   ;;  %v3169_v23 = vld [vmem:[%s4384_s1 + $0x30] sm:$0xff] }
 0x245   :  { %v2176_v29 = vmul.f32 %v3154_v14, %v2023_v42  ;;  %v1984_v45 = vmul.f32 %v3155_v16, %v1831_v18  ;;  %v2275_v17 = vsel %vm2273_vm2, %v1831_v18, %v2023_v42  ;;  %2172 = vperm.xlu1 %2833, %v1822_v12  }
 0x246   :  { %2308 = vst.msk [vmem:[%s4386_s5 + $0x8] sm:$0xff] %vm2306_vm3, %v2275_v17 }
 0x247   :  { %v2208_v24 = vadd.f32 %v2176_v29, %v1984_v45  ;;  %v3170_v45 = vld [vmem:[%s4383_s0 + $0x48] sm:$0xff] }
 0x248   :  { %v1841_v28 = vpop.permute.xlu1 %1840  ;;  %2167 = vperm.xlu0 %2832, %v1821_v33  }
 0x249   :  { %2240 = vst.msk [vmem:[%s4387_s4 + $0x8] sm:$0xff] %vm57_vm0, %v2208_v24  ;;  %v1986_v26 = vmul.f32 %v3156_v21, %v1841_v28  ;;  %v3171_v24 = vld [vmem:[%s4384_s1 + $0x48] sm:$0xff]  ;;  %v3172_v21 = vld [vmem:[%s4383_s0 + $0x40] sm:$0xff] }
 0x24b   :  { %v1826_v25 = vpop.permute.xlu0 %1825 }
 0x24c   :  { %v2033_v32 = vpop.permute.xlu1 %2032  ;;  %v1983_v36 = vmul.f32 %v3158_v34, %v1826_v25 }
 0x24d   :  { %v2178_v13 = vmul.f32 %v3157_v27, %v2033_v32  ;;  %v2277_v9 = vsel %vm2273_vm2, %v1841_v28, %v2033_v32  ;;  %v3173_v27 = vld [vmem:[%s4384_s1 + $0x40] sm:$0xff] }
 0x24e   :  { %2310 = vst.msk [vmem:[%s4386_s5 + $0x18] sm:$0xff] %vm2306_vm3, %v2277_v9 }
 0x24f   :  { %v2210_v43 = vadd.f32 %v2178_v13, %v1986_v26  ;;  %v2018_v30 = vpop.permute.xlu0 %2017 }
 0x250   :  { %v1836_v51 = vpop.permute.xlu1 %1835  ;;  %v2175_v38 = vmul.f32 %v3159_v37, %v2018_v30  ;;  %v2274_v6 = vsel %vm2273_vm2, %v1826_v25, %v2018_v30 }
 0x251   :  { %2242 = vst.msk [vmem:[%s4387_s4 + $0x18] sm:$0xff] %vm57_vm0, %v2210_v43  ;;  %v1985_v40 = vmul.f32 %v3160_v15, %v1836_v51 }
 0x252   :  { %2307 = vst.msk [vmem:[%s4386_s5] sm:$0xff] %vm2306_vm3, %v2274_v6  ;;  %v2207_v46 = vadd.f32 %v2175_v38, %v1983_v36  ;;  %v3174_v36 = vld [vmem:[%s4383_s0 + $0x58] sm:$0xff] }
 0x253   :  { %v2028_v1 = vpop.permute.xlu0 %2027  ;;  %v3175_v38 = vld [vmem:[%s4384_s1 + $0x58] sm:$0xff] }
 0x254   :  { %2239 = vst.msk [vmem:[%s4387_s4] sm:$0xff] %vm57_vm0, %v2207_v46  ;;  %v2177_v60 = vmul.f32 %v3161_v44, %v2028_v1  ;;  %v2276_v39 = vsel %vm2273_vm2, %v1836_v51, %v2028_v1  ;;  %v1851_v47 = vpop.permute.xlu1 %1850  ;;  %v3176_v1 = vld [vmem:[%s4383_s0 + $0x50] sm:$0xff] }
 0x255   :  { %2309 = vst.msk [vmem:[%s4386_s5 + $0x10] sm:$0xff] %vm2306_vm3, %v2276_v39  ;;  %v1988_v49 = vmul.f32 %v3162_v0, %v1851_v47 }
 0x256   :  { %v2209_v11 = vadd.f32 %v2177_v60, %v1985_v40  ;;  %v3177_v60 = vld [vmem:[%s4384_s1 + $0x50] sm:$0xff] }
 0x257   :  { %v1846_v48 = vpop.permute.xlu0 %1845 }
 0x258   :  { %2241 = vst.msk [vmem:[%s4387_s4 + $0x10] sm:$0xff] %vm57_vm0, %v2209_v11  ;;  %v2043_v22 = vpop.permute.xlu1 %2042  ;;  %v1987_v55 = vmul.f32 %v3164_v53, %v1846_v48 }
 0x259   :  { %v2180_v50 = vmul.f32 %v3163_v41, %v2043_v22  ;;  %v2279_v52 = vsel %vm2273_vm2, %v1851_v47, %v2043_v22 }
 0x25a   :  { %2312 = vst.msk [vmem:[%s4386_s5 + $0x28] sm:$0xff] %vm2306_vm3, %v2279_v52 }
 0x25b   :  { %v2212_v54 = vadd.f32 %v2180_v50, %v1988_v49  ;;  %v2038_v19 = vpop.permute.xlu0 %2037  ;;  %v3178_v49 = vld [vmem:[%s4383_s0 + $0x68] sm:$0xff] }
 0x25c   :  { %v2179_v57 = vmul.f32 %v3165_v59, %v2038_v19  ;;  %v2278_v5 = vsel %vm2273_vm2, %v1846_v48, %v2038_v19  ;;  %v1861_v56 = vpop.permute.xlu1 %1860  ;;  %v3179_v50 = vld [vmem:[%s4384_s1 + $0x68] sm:$0xff] }
 0x25d   :  { %2244 = vst.msk [vmem:[%s4387_s4 + $0x28] sm:$0xff] %vm57_vm0, %v2212_v54  ;;  %v1990_v31 = vmul.f32 %v3166_v62, %v1861_v56 }
 0x25e   :  { %2311 = vst.msk [vmem:[%s4386_s5 + $0x20] sm:$0xff] %vm2306_vm3, %v2278_v5  ;;  %v2211_v58 = vadd.f32 %v2179_v57, %v1987_v55  ;;  %v3180_v55 = vld [vmem:[%s4383_s0 + $0x60] sm:$0xff] }
 0x25f   :  { %v1856_v61 = vpop.permute.xlu0 %1855  ;;  %v3181_v57 = vld [vmem:[%s4384_s1 + $0x60] sm:$0xff] }
 0x260   :  { %2243 = vst.msk [vmem:[%s4387_s4 + $0x20] sm:$0xff] %vm57_vm0, %v2211_v58  ;;  %v2053_v63 = vpop.permute.xlu1 %2052  ;;  %v1989_v35 = vmul.f32 %v3168_v10, %v1856_v61 }
 0x261   :  { %v2182_v20 = vmul.f32 %v3167_v3, %v2053_v63  ;;  %v2281_v2 = vsel %vm2273_vm2, %v1861_v56, %v2053_v63 }
 0x262   :  { %2314 = vst.msk [vmem:[%s4386_s5 + $0x38] sm:$0xff] %vm2306_vm3, %v2281_v2 }
 0x263   :  { %v2214_v7 = vadd.f32 %v2182_v20, %v1990_v31  ;;  %v2048_v4 = vpop.permute.xlu0 %2047  ;;  %v3182_v31 = vld [vmem:[%s4383_s0 + $0x78] sm:$0xff] }
 0x264   :  { %v2181_v42 = vmul.f32 %v3169_v23, %v2048_v4  ;;  %v2280_v18 = vsel %vm2273_vm2, %v1856_v61, %v2048_v4  ;;  %v1871_v12 = vpop.permute.xlu1 %1870  ;;  %v3183_v20 = vld [vmem:[%s4384_s1 + $0x78] sm:$0xff] }
 0x265   :  { %2246 = vst.msk [vmem:[%s4387_s4 + $0x38] sm:$0xff] %vm57_vm0, %v2214_v7  ;;  %v1992_v17 = vmul.f32 %v3170_v45, %v1871_v12 }
 0x266   :  { %2313 = vst.msk [vmem:[%s4386_s5 + $0x30] sm:$0xff] %vm2306_vm3, %v2280_v18  ;;  %v2213_v14 = vadd.f32 %v2181_v42, %v1989_v35  ;;  %v3184_v35 = vld [vmem:[%s4383_s0 + $0x70] sm:$0xff] }
 0x267   :  { %v1866_v29 = vpop.permute.xlu0 %1865  ;;  %v3185_v42 = vld [vmem:[%s4384_s1 + $0x70] sm:$0xff] }
 0x268   :  { %2245 = vst.msk [vmem:[%s4387_s4 + $0x30] sm:$0xff] %vm57_vm0, %v2213_v14  ;;  %v2063_v16 = vpop.permute.xlu1 %2062  ;;  %v1991_v26 = vmul.f32 %v3172_v21, %v1866_v29 }
 0x269   :  { %v2184_v33 = vmul.f32 %v3171_v24, %v2063_v16  ;;  %v2283_v28 = vsel %vm2273_vm2, %v1871_v12, %v2063_v16 }
 0x26a   :  { %2316 = vst.msk [vmem:[%s4386_s5 + $0x48] sm:$0xff] %vm2306_vm3, %v2283_v28 }
 0x26b   :  { %v2216_v25 = vadd.f32 %v2184_v33, %v1992_v17  ;;  %v2058_v32 = vpop.permute.xlu0 %2057  ;;  %v3186_v17 = vld [vmem:[%s4383_s0 + $0x88] sm:$0xff] }
 0x26c   :  { %v2183_v13 = vmul.f32 %v3173_v27, %v2058_v32  ;;  %v2282_v9 = vsel %vm2273_vm2, %v1866_v29, %v2058_v32  ;;  %v1881_v43 = vpop.permute.xlu1 %1880  ;;  %v3187_v33 = vld [vmem:[%s4384_s1 + $0x88] sm:$0xff] }
 0x26d   :  { %2248 = vst.msk [vmem:[%s4387_s4 + $0x48] sm:$0xff] %vm57_vm0, %v2216_v25  ;;  %v1994_v37 = vmul.f32 %v3174_v36, %v1881_v43 }
 0x26e   :  { %2315 = vst.msk [vmem:[%s4386_s5 + $0x40] sm:$0xff] %vm2306_vm3, %v2282_v9  ;;  %v2215_v30 = vadd.f32 %v2183_v13, %v1991_v26  ;;  %v3188_v26 = vld [vmem:[%s4383_s0 + $0x80] sm:$0xff] }
 0x26f   :  { %v1876_v51 = vpop.permute.xlu0 %1875  ;;  %v3189_v13 = vld [vmem:[%s4384_s1 + $0x80] sm:$0xff] }
 0x270   :  { %2247 = vst.msk [vmem:[%s4387_s4 + $0x40] sm:$0xff] %vm57_vm0, %v2215_v30  ;;  %v2073_v34 = vpop.permute.xlu1 %2072  ;;  %v1993_v44 = vmul.f32 %v3176_v1, %v1876_v51 }
 0x271   :  { %v2186_v6 = vmul.f32 %v3175_v38, %v2073_v34  ;;  %v2285_v46 = vsel %vm2273_vm2, %v1881_v43, %v2073_v34 }
 0x272   :  { %2318 = vst.msk [vmem:[%s4386_s5 + $0x58] sm:$0xff] %vm2306_vm3, %v2285_v46 }
 0x273   :  { %v2218_v15 = vadd.f32 %v2186_v6, %v1994_v37  ;;  %v2068_v40 = vpop.permute.xlu0 %2067  ;;  %v3190_v37 = vld [vmem:[%s4383_s0 + $0x98] sm:$0xff] }
 0x274   :  { %v2185_v39 = vmul.f32 %v3177_v60, %v2068_v40  ;;  %v2284_v47 = vsel %vm2273_vm2, %v1876_v51, %v2068_v40  ;;  %v1891_v11 = vpop.permute.xlu1 %1890  ;;  %v3191_v6 = vld [vmem:[%s4384_s1 + $0x98] sm:$0xff] }
 0x275   :  { %2250 = vst.msk [vmem:[%s4387_s4 + $0x58] sm:$0xff] %vm57_vm0, %v2218_v15  ;;  %v1996_v41 = vmul.f32 %v3178_v49, %v1891_v11 }
 0x276   :  { %2317 = vst.msk [vmem:[%s4386_s5 + $0x50] sm:$0xff] %vm2306_vm3, %v2284_v47  ;;  %v2217_v48 = vadd.f32 %v2185_v39, %v1993_v44  ;;  %v3192_v44 = vld [vmem:[%s4383_s0 + $0x90] sm:$0xff] }
 0x277   :  { %v1886_v22 = vpop.permute.xlu0 %1885  ;;  %v3193_v39 = vld [vmem:[%s4384_s1 + $0x90] sm:$0xff] }
 0x278   :  { %2249 = vst.msk [vmem:[%s4387_s4 + $0x50] sm:$0xff] %vm57_vm0, %v2217_v48  ;;  %v2083_v0 = vpop.permute.xlu1 %2082  ;;  %v1995_v59 = vmul.f32 %v3180_v55, %v1886_v22 }
 0x279   :  { %v2188_v52 = vmul.f32 %v3179_v50, %v2083_v0  ;;  %v2287_v54 = vsel %vm2273_vm2, %v1891_v11, %v2083_v0 }
 0x27a   :  { %2320 = vst.msk [vmem:[%s4386_s5 + $0x68] sm:$0xff] %vm2306_vm3, %v2287_v54 }
 0x27b   :  { %v2220_v19 = vadd.f32 %v2188_v52, %v1996_v41  ;;  %v2078_v53 = vpop.permute.xlu0 %2077  ;;  %v3194_v41 = vld [vmem:[%s4383_s0 + $0xa8] sm:$0xff] }
 0x27c   :  { %v2187_v5 = vmul.f32 %v3181_v57, %v2078_v53  ;;  %v2286_v56 = vsel %vm2273_vm2, %v1886_v22, %v2078_v53  ;;  %v1901_v58 = vpop.permute.xlu1 %1900  ;;  %v3195_v52 = vld [vmem:[%s4384_s1 + $0xa8] sm:$0xff] }
 0x27d   :  { %2252 = vst.msk [vmem:[%s4387_s4 + $0x68] sm:$0xff] %vm57_vm0, %v2220_v19  ;;  %v1998_v3 = vmul.f32 %v3182_v31, %v1901_v58 }
 0x27e   :  { %2319 = vst.msk [vmem:[%s4386_s5 + $0x60] sm:$0xff] %vm2306_vm3, %v2286_v56  ;;  %v2219_v61 = vadd.f32 %v2187_v5, %v1995_v59  ;;  %v3196_v59 = vld [vmem:[%s4383_s0 + $0xa0] sm:$0xff] }
 0x27f   :  { %v1896_v63 = vpop.permute.xlu0 %1895  ;;  %v3197_v5 = vld [vmem:[%s4384_s1 + $0xa0] sm:$0xff] }
 0x280   :  { %2251 = vst.msk [vmem:[%s4387_s4 + $0x60] sm:$0xff] %vm57_vm0, %v2219_v61  ;;  %v2093_v62 = vpop.permute.xlu1 %2092  ;;  %v1997_v23 = vmul.f32 %v3184_v35, %v1896_v63 }
 0x281   :  { %v2190_v2 = vmul.f32 %v3183_v20, %v2093_v62  ;;  %v2289_v7 = vsel %vm2273_vm2, %v1901_v58, %v2093_v62 }
 0x282   :  { %2322 = vst.msk [vmem:[%s4386_s5 + $0x78] sm:$0xff] %vm2306_vm3, %v2289_v7 }
 0x283   :  { %v2222_v4 = vadd.f32 %v2190_v2, %v1998_v3  ;;  %v2088_v10 = vpop.permute.xlu0 %2087  ;;  %v3198_v3 = vld [vmem:[%s4383_s0 + $0xb8] sm:$0xff] }
 0x284   :  { %v2189_v18 = vmul.f32 %v3185_v42, %v2088_v10  ;;  %v2288_v12 = vsel %vm2273_vm2, %v1896_v63, %v2088_v10  ;;  %v1911_v14 = vpop.permute.xlu1 %1910  ;;  %v3199_v2 = vld [vmem:[%s4384_s1 + $0xb8] sm:$0xff] }
 0x285   :  { %2254 = vst.msk [vmem:[%s4387_s4 + $0x78] sm:$0xff] %vm57_vm0, %v2222_v4  ;;  %v2000_v24 = vmul.f32 %v3186_v17, %v1911_v14 }
 0x286   :  { %2321 = vst.msk [vmem:[%s4386_s5 + $0x70] sm:$0xff] %vm2306_vm3, %v2288_v12  ;;  %v2221_v29 = vadd.f32 %v2189_v18, %v1997_v23  ;;  %v3200_v23 = vld [vmem:[%s4383_s0 + $0xb0] sm:$0xff] }
 0x287   :  { %v1906_v16 = vpop.permute.xlu0 %1905  ;;  %v3201_v18 = vld [vmem:[%s4384_s1 + $0xb0] sm:$0xff] }
 0x288   :  { %2253 = vst.msk [vmem:[%s4387_s4 + $0x70] sm:$0xff] %vm57_vm0, %v2221_v29  ;;  %v2103_v45 = vpop.permute.xlu1 %2102  ;;  %v1999_v27 = vmul.f32 %v3188_v26, %v1906_v16 }
 0x289   :  { %v2192_v28 = vmul.f32 %v3187_v33, %v2103_v45  ;;  %v2291_v25 = vsel %vm2273_vm2, %v1911_v14, %v2103_v45 }
 0x28a   :  { %2324 = vst.msk [vmem:[%s4386_s5 + $0x88] sm:$0xff] %vm2306_vm3, %v2291_v25 }
 0x28b   :  { %v2224_v32 = vadd.f32 %v2192_v28, %v2000_v24  ;;  %v2098_v21 = vpop.permute.xlu0 %2097  ;;  %v3202_v24 = vld [vmem:[%s4383_s0 + $0xc8] sm:$0xff] }
 0x28c   :  { %v2191_v9 = vmul.f32 %v3189_v13, %v2098_v21  ;;  %v2290_v43 = vsel %vm2273_vm2, %v1906_v16, %v2098_v21  ;;  %v1921_v30 = vpop.permute.xlu1 %1920  ;;  %v3203_v28 = vld [vmem:[%s4384_s1 + $0xc8] sm:$0xff] }
 0x28d   :  { %2256 = vst.msk [vmem:[%s4387_s4 + $0x88] sm:$0xff] %vm57_vm0, %v2224_v32  ;;  %v2002_v38 = vmul.f32 %v3190_v37, %v1921_v30 }
 0x28e   :  { %2323 = vst.msk [vmem:[%s4386_s5 + $0x80] sm:$0xff] %vm2306_vm3, %v2290_v43  ;;  %v2223_v51 = vadd.f32 %v2191_v9, %v1999_v27  ;;  %v3204_v27 = vld [vmem:[%s4383_s0 + $0xc0] sm:$0xff] }
 0x28f   :  { %v1916_v34 = vpop.permute.xlu0 %1915  ;;  %v3205_v9 = vld [vmem:[%s4384_s1 + $0xc0] sm:$0xff] }
 0x290   :  { %2255 = vst.msk [vmem:[%s4387_s4 + $0x80] sm:$0xff] %vm57_vm0, %v2223_v51  ;;  %v2113_v36 = vpop.permute.xlu1 %2112  ;;  %v2001_v60 = vmul.f32 %v3192_v44, %v1916_v34 }
 0x291   :  { %v2194_v46 = vmul.f32 %v3191_v6, %v2113_v36  ;;  %v2293_v15 = vsel %vm2273_vm2, %v1921_v30, %v2113_v36 }
 0x292   :  { %2326 = vst.msk [vmem:[%s4386_s5 + $0x98] sm:$0xff] %vm2306_vm3, %v2293_v15 }
 0x293   :  { %v2226_v40 = vadd.f32 %v2194_v46, %v2002_v38  ;;  %v2108_v1 = vpop.permute.xlu0 %2107  ;;  %v3206_v38 = vld [vmem:[%s4383_s0 + $0xd8] sm:$0xff] }
 0x294   :  { %v2193_v47 = vmul.f32 %v3193_v39, %v2108_v1  ;;  %v2292_v11 = vsel %vm2273_vm2, %v1916_v34, %v2108_v1  ;;  %v1931_v48 = vpop.permute.xlu1 %1930  ;;  %v3207_v46 = vld [vmem:[%s4384_s1 + $0xd8] sm:$0xff] }
 0x295   :  { %2258 = vst.msk [vmem:[%s4387_s4 + $0x98] sm:$0xff] %vm57_vm0, %v2226_v40  ;;  %v2004_v50 = vmul.f32 %v3194_v41, %v1931_v48 }
 0x296   :  { %2325 = vst.msk [vmem:[%s4386_s5 + $0x90] sm:$0xff] %vm2306_vm3, %v2292_v11  ;;  %v2225_v22 = vadd.f32 %v2193_v47, %v2001_v60  ;;  %v3208_v60 = vld [vmem:[%s4383_s0 + $0xd0] sm:$0xff] }
 0x297   :  { %v1926_v0 = vpop.permute.xlu0 %1925  ;;  %v3209_v47 = vld [vmem:[%s4384_s1 + $0xd0] sm:$0xff] }
 0x298   :  { %2257 = vst.msk [vmem:[%s4387_s4 + $0x90] sm:$0xff] %vm57_vm0, %v2225_v22  ;;  %v2123_v49 = vpop.permute.xlu1 %2122  ;;  %v2003_v57 = vmul.f32 %v3196_v59, %v1926_v0 }
 0x299   :  { %v2196_v54 = vmul.f32 %v3195_v52, %v2123_v49  ;;  %v2295_v19 = vsel %vm2273_vm2, %v1931_v48, %v2123_v49 }
 0x29a   :  { %2328 = vst.msk [vmem:[%s4386_s5 + $0xa8] sm:$0xff] %vm2306_vm3, %v2295_v19 }
 0x29b   :  { %v2228_v53 = vadd.f32 %v2196_v54, %v2004_v50  ;;  %v2118_v55 = vpop.permute.xlu0 %2117  ;;  %v3210_v50 = vld [vmem:[%s4383_s0 + $0xe8] sm:$0xff] }
 0x29c   :  { %v2195_v56 = vmul.f32 %v3197_v5, %v2118_v55  ;;  %v2294_v58 = vsel %vm2273_vm2, %v1926_v0, %v2118_v55  ;;  %v1941_v61 = vpop.permute.xlu1 %1940  ;;  %v3211_v54 = vld [vmem:[%s4384_s1 + $0xe8] sm:$0xff] }
 0x29d   :  { %2260 = vst.msk [vmem:[%s4387_s4 + $0xa8] sm:$0xff] %vm57_vm0, %v2228_v53  ;;  %v2006_v20 = vmul.f32 %v3198_v3, %v1941_v61 }
 0x29e   :  { %2327 = vst.msk [vmem:[%s4386_s5 + $0xa0] sm:$0xff] %vm2306_vm3, %v2294_v58  ;;  %v2227_v63 = vadd.f32 %v2195_v56, %v2003_v57  ;;  %v3212_v57 = vld [vmem:[%s4383_s0 + $0xe0] sm:$0xff] }
 0x29f   :  { %v1936_v62 = vpop.permute.xlu0 %1935  ;;  %v3213_v56 = vld [vmem:[%s4384_s1 + $0xe0] sm:$0xff] }
 0x2a0   :  { %2259 = vst.msk [vmem:[%s4387_s4 + $0xa0] sm:$0xff] %vm57_vm0, %v2227_v63  ;;  %v2133_v31 = vpop.permute.xlu1 %2132  ;;  %v2005_v42 = vmul.f32 %v3200_v23, %v1936_v62 }
 0x2a1   :  { %v2198_v7 = vmul.f32 %v3199_v2, %v2133_v31  ;;  %v2297_v4 = vsel %vm2273_vm2, %v1941_v61, %v2133_v31 }
 0x2a2   :  { %2330 = vst.msk [vmem:[%s4386_s5 + $0xb8] sm:$0xff] %vm2306_vm3, %v2297_v4 }
 0x2a3   :  { %v2230_v10 = vadd.f32 %v2198_v7, %v2006_v20  ;;  %v2128_v35 = vpop.permute.xlu0 %2127  ;;  %v3214_v20 = vld [vmem:[%s4383_s0 + $0xf8] sm:$0xff] }
 0x2a4   :  { %v2197_v12 = vmul.f32 %v3201_v18, %v2128_v35  ;;  %v2296_v14 = vsel %vm2273_vm2, %v1936_v62, %v2128_v35  ;;  %v1951_v29 = vpop.permute.xlu1 %1950  ;;  %v3215_v7 = vld [vmem:[%s4384_s1 + $0xf8] sm:$0xff] }
 0x2a5   :  { %2262 = vst.msk [vmem:[%s4387_s4 + $0xb8] sm:$0xff] %vm57_vm0, %v2230_v10  ;;  %v2008_v33 = vmul.f32 %v3202_v24, %v1951_v29 }
 0x2a6   :  { %2329 = vst.msk [vmem:[%s4386_s5 + $0xb0] sm:$0xff] %vm2306_vm3, %v2296_v14  ;;  %v2229_v16 = vadd.f32 %v2197_v12, %v2005_v42  ;;  %v3216_v42 = vld [vmem:[%s4383_s0 + $0xf0] sm:$0xff] }
 0x2a7   :  { %v1946_v45 = vpop.permute.xlu0 %1945  ;;  %v3217_v12 = vld [vmem:[%s4384_s1 + $0xf0] sm:$0xff] }
 0x2a8   :  { %2261 = vst.msk [vmem:[%s4387_s4 + $0xb0] sm:$0xff] %vm57_vm0, %v2229_v16  ;;  %v2143_v17 = vpop.permute.xlu1 %2142  ;;  %v2007_v13 = vmul.f32 %v3204_v27, %v1946_v45 }
 0x2a9   :  { %v2200_v25 = vmul.f32 %v3203_v28, %v2143_v17  ;;  %v2299_v32 = vsel %vm2273_vm2, %v1951_v29, %v2143_v17 }
 0x2aa   :  { %2332 = vst.msk [vmem:[%s4386_s5 + $0xc8] sm:$0xff] %vm2306_vm3, %v2299_v32 }
 0x2ab   :  { %v2232_v21 = vadd.f32 %v2200_v25, %v2008_v33  ;;  %v2138_v26 = vpop.permute.xlu0 %2137 }
 0x2ac   :  { %v2199_v43 = vmul.f32 %v3205_v9, %v2138_v26  ;;  %v2298_v30 = vsel %vm2273_vm2, %v1946_v45, %v2138_v26  ;;  %v1961_v51 = vpop.permute.xlu1 %1960 }
 0x2ad   :  { %2264 = vst.msk [vmem:[%s4387_s4 + $0xc8] sm:$0xff] %vm57_vm0, %v2232_v21  ;;  %v2010_v6 = vmul.f32 %v3206_v38, %v1961_v51 }
 0x2ae   :  { %2331 = vst.msk [vmem:[%s4386_s5 + $0xc0] sm:$0xff] %vm2306_vm3, %v2298_v30  ;;  %v2231_v34 = vadd.f32 %v2199_v43, %v2007_v13 }
 0x2af   :  { %v1956_v36 = vpop.permute.xlu0 %1955 }
 0x2b0   :  { %2263 = vst.msk [vmem:[%s4387_s4 + $0xc0] sm:$0xff] %vm57_vm0, %v2231_v34  ;;  %v2153_v37 = vpop.permute.xlu1 %2152  ;;  %v2009_v39 = vmul.f32 %v3208_v60, %v1956_v36 }
 0x2b1   :  { %v2202_v15 = vmul.f32 %v3207_v46, %v2153_v37  ;;  %v2301_v40 = vsel %vm2273_vm2, %v1961_v51, %v2153_v37 }
 0x2b2   :  { %2334 = vst.msk [vmem:[%s4386_s5 + $0xd8] sm:$0xff] %vm2306_vm3, %v2301_v40 }
 0x2b3   :  { %v2234_v1 = vadd.f32 %v2202_v15, %v2010_v6  ;;  %v2148_v44 = vpop.permute.xlu0 %2147 }
 0x2b4   :  { %v2201_v11 = vmul.f32 %v3209_v47, %v2148_v44  ;;  %v2300_v48 = vsel %vm2273_vm2, %v1956_v36, %v2148_v44  ;;  %v1971_v22 = vpop.permute.xlu1 %1970 }
 0x2b5   :  { %2266 = vst.msk [vmem:[%s4387_s4 + $0xd8] sm:$0xff] %vm57_vm0, %v2234_v1  ;;  %v2012_v52 = vmul.f32 %v3210_v50, %v1971_v22 }
 0x2b6   :  { %2333 = vst.msk [vmem:[%s4386_s5 + $0xd0] sm:$0xff] %vm2306_vm3, %v2300_v48  ;;  %v2233_v0 = vadd.f32 %v2201_v11, %v2009_v39 }
 0x2b7   :  { %v1966_v49 = vpop.permute.xlu0 %1965 }
 0x2b8   :  { %2265 = vst.msk [vmem:[%s4387_s4 + $0xd0] sm:$0xff] %vm57_vm0, %v2233_v0  ;;  %v2163_v41 = vpop.permute.xlu1 %2162  ;;  %v2011_v5 = vmul.f32 %v3212_v57, %v1966_v49 }
 0x2b9   :  { %v2204_v19 = vmul.f32 %v3211_v54, %v2163_v41  ;;  %v2303_v53 = vsel %vm2273_vm2, %v1971_v22, %v2163_v41 }
 0x2ba   :  { %2336 = vst.msk [vmem:[%s4386_s5 + $0xe8] sm:$0xff] %vm2306_vm3, %v2303_v53 }
 0x2bb   :  { %v2236_v55 = vadd.f32 %v2204_v19, %v2012_v52  ;;  %v2158_v59 = vpop.permute.xlu0 %2157 }
 0x2bc   :  { %v2203_v58 = vmul.f32 %v3213_v56, %v2158_v59  ;;  %v2302_v61 = vsel %vm2273_vm2, %v1966_v49, %v2158_v59  ;;  %v1981_v63 = vpop.permute.xlu1 %1980 }
 0x2bd   :  { %2268 = vst.msk [vmem:[%s4387_s4 + $0xe8] sm:$0xff] %vm57_vm0, %v2236_v55  ;;  %v2014_v2 = vmul.f32 %v3214_v20, %v1981_v63 }
 0x2be   :  { %2335 = vst.msk [vmem:[%s4386_s5 + $0xe0] sm:$0xff] %vm2306_vm3, %v2302_v61  ;;  %v2235_v62 = vadd.f32 %v2203_v58, %v2011_v5 }
 0x2bf   :  { %v1976_v31 = vpop.permute.xlu0 %1975 }
 0x2c0   :  { %2267 = vst.msk [vmem:[%s4387_s4 + $0xe0] sm:$0xff] %vm57_vm0, %v2235_v62  ;;  %v2173_v3 = vpop.permute.xlu1 %2172  ;;  %v2013_v18 = vmul.f32 %v3216_v42, %v1976_v31 }
 0x2c1   :  { %v2206_v4 = vmul.f32 %v3215_v7, %v2173_v3  ;;  %v2305_v10 = vsel %vm2273_vm2, %v1981_v63, %v2173_v3 }
 0x2c2   :  { %2338 = vst.msk [vmem:[%s4386_s5 + $0xf8] sm:$0xff] %vm2306_vm3, %v2305_v10 }
 0x2c3   :  { %v2238_v35 = vadd.f32 %v2206_v4, %v2014_v2  ;;  %v2168_v23 = vpop.permute.xlu0 %2167 }
 0x2c4   :  { %v2205_v14 = vmul.f32 %v3217_v12, %v2168_v23  ;;  %v2304_v29 = vsel %vm2273_vm2, %v1976_v31, %v2168_v23 }
 0x2c5   :  { %2270 = vst.msk [vmem:[%s4387_s4 + $0xf8] sm:$0xff] %vm57_vm0, %v2238_v35 }
 0x2c6   :  { %2337 = vst.msk [vmem:[%s4386_s5 + $0xf0] sm:$0xff] %vm2306_vm3, %v2304_v29  ;;  %v2237_v16 = vadd.f32 %v2205_v14, %v2013_v18 }
 0x2c8   :  { %2269 = vst.msk [vmem:[%s4387_s4 + $0xf0] sm:$0xff] %vm57_vm0, %v2237_v16 }

</bundles_post_ra>
